<compile_context>
chip_gen: v7x
topology: tpu7x:2x2x1
jax: 0.10.0
libtpu: 0.0.40
codegen_flags: <defaults>
</compile_context>

<pallas_src>
import jax
import jax.numpy as jnp
from jax import lax
from jax.experimental import pallas as pl
from jax.experimental.pallas import tpu as pltpu

BN_EPS = 1e-3  # matches nn.BatchNorm2d(eps=0.001)


def _round_up(v, m):
    return -(-v // m) * m


# ---------------------------------------------------------------------------
# Kernel 1: fused multi-input 1x1 conv + folded BatchNorm + SiLU.
#   y = SiLU(sum_i W_i @ X_i + b)   on channels-first (C, M) lane tiles.
# ---------------------------------------------------------------------------
def _make_conv_kernel(n_in):
    def kernel(*refs):
        xs = refs[:n_in]
        ws = refs[n_in:2 * n_in]
        b_ref = refs[2 * n_in]
        o_ref = refs[2 * n_in + 1]
        acc = jnp.dot(ws[0][...].astype(jnp.float32),
                      xs[0][...].astype(jnp.float32),
                      preferred_element_type=jnp.float32)          # MXU
        for x_ref, w_ref in zip(xs[1:], ws[1:]):
            acc = acc + jnp.dot(w_ref[...].astype(jnp.float32),
                                x_ref[...].astype(jnp.float32),
                                preferred_element_type=jnp.float32)
        y = acc + b_ref[...].astype(jnp.float32)
        y = y * (1.0 / (1.0 + jnp.exp(-y)))                        # SiLU (EUP)
        o_ref[...] = y.astype(o_ref.dtype)
    return kernel


def _pick_lane_tile(m, c_rows):
    """Largest lane-dense tile that keeps double-buffered tiles in VMEM."""
    budget_elems = 4 * 1024 * 1024            # ~16 MiB of f32 per tile set
    t = (budget_elems // max(c_rows, 1)) // 128 * 128
    t = max(128, min(2048, t))
    return m if m <= t else t                 # ragged tail is fine (per-column op)


def conv1x1_bn_silu(xs, ws, b):
    """xs[i]: (Cin_i, M) channels-first activations; ws[i]: (Cout, Cin_i)."""
    n_in = len(xs)
    m = xs[0].shape[1]
    c_out = ws[0].shape[0]
    cop = _round_up(c_out, 8)

    xs_p, ws_p, cips = [], [], []
    for x, w in zip(xs, ws):
        c_in = x.shape[0]
        cip = _round_up(c_in, 8)
        if cip != c_in:
            x = jnp.pad(x, ((0, cip - c_in), (0, 0)))
            w = jnp.pad(w, ((0, 0), (0, cip - c_in)))
        if cop != c_out:
            w = jnp.pad(w, ((0, cop - c_out), (0, 0)))
        xs_p.append(x)
        ws_p.append(w)
        cips.append(cip)
    if cop != c_out:
        b = jnp.pad(b, ((0, cop - c_out),))

    tl = _pick_lane_tile(m, cop + sum(cips))
    grid = (pl.cdiv(m, tl),)

    in_specs = (
        [pl.BlockSpec((cip, tl), lambda i: (0, i)) for cip in cips]
        + [pl.BlockSpec((cop, cip), lambda i: (0, 0)) for cip in cips]
        + [pl.BlockSpec((cop, 1), lambda i: (0, 0))]
    )

    itemsize = xs_p[0].dtype.itemsize
    cost = pl.CostEstimate(
        flops=2 * cop * sum(cips) * m + 4 * cop * m,
        transcendentals=cop * m,
        bytes_accessed=(sum(cips) * m + cop * m
                        + cop * sum(cips) + cop) * itemsize,
    )

    out = pl.pallas_call(
        _make_conv_kernel(n_in),
        out_shape=jax.ShapeDtypeStruct((cop, m), xs_p[0].dtype),
        grid_spec=pl.GridSpec(
            grid=grid,
            in_specs=in_specs,
            out_specs=pl.BlockSpec((cop, tl), lambda i: (0, i)),
        ),
        compiler_params=pltpu.CompilerParams(
            dimension_semantics=("parallel",),
        ),
        cost_estimate=cost,
    )(*xs_p, *ws_p, b.reshape(cop, 1))
    return out[:c_out]


# ---------------------------------------------------------------------------
# Kernel 2: fused SPP max pools, stride 1, "same" (-inf) padding.
# ---------------------------------------------------------------------------
def _make_spp_kernel_5_9_13(h, w):
    """Hierarchical separable running maxima for k = (5, 9, 13)."""
    def kernel(xp_ref, o5_ref, o9_ref, o13_ref):
        xp = xp_ref[...]                                    # (TP, h+12, w+12)

        # ---- width axis: window-5 maxima, then 9 from 5, 13 from 9 ----
        c5 = xp[:, :, 0:w + 8]                              # win5 @ padded cols 2..w+9
        for d in range(1, 5):
            c5 = jnp.maximum(c5, xp[:, :, d:d + w + 8])
        c9 = jnp.maximum(c5[:, :, 0:w + 4], c5[:, :, 4:w + 8])   # win9 @ 4..w+7
        c13 = jnp.maximum(c9[:, :, 0:w], c9[:, :, 4:w + 4])      # win13 @ 6..w+5

        c5w = c5[:, :, 4:w + 4]      # win-5 column maxima at real columns
        c9w = c9[:, :, 2:w + 2]      # win-9 column maxima at real columns

        # ---- height axis ----
        p5 = c5w[:, 4:4 + h, :]
        for d in range(1, 5):
            p5 = jnp.maximum(p5, c5w[:, 4 + d:4 + d + h, :])
        o5_ref[...] = p5.astype(o5_ref.dtype)

        r5c9 = c9w[:, 2:2 + h + 4, :]
        for d in range(1, 5):
            r5c9 = jnp.maximum(r5c9, c9w[:, 2 + d:2 + d + h + 4, :])
        p9 = jnp.maximum(r5c9[:, 0:h, :], r5c9[:, 4:h + 4, :])
        o9_ref[...] = p9.astype(o9_ref.dtype)

        r5c13 = c13[:, 0:h + 8, :]
        for d in range(1, 5):
            r5c13 = jnp.maximum(r5c13, c13[:, d:d + h + 8, :])
        r9c13 = jnp.maximum(r5c13[:, 0:h + 4, :], r5c13[:, 4:h + 8, :])
        p13 = jnp.maximum(r9c13[:, 0:h, :], r9c13[:, 4:h + 4, :])
        o13_ref[...] = p13.astype(o13_ref.dtype)

    return kernel


def _make_spp_kernel_generic(ks, h, w, pmax):
    """Per-k separable running maxima (fallback for arbitrary odd kernels)."""
    def kernel(xp_ref, *out_refs):
        xp = xp_ref[...]
        for k, o_ref in zip(ks, out_refs):
            p = k // 2
            col = xp[:, :, pmax - p:pmax - p + w]
            for j in range(pmax - p + 1, pmax + p + 1):
                col = jnp.maximum(col, xp[:, :, j:j + w])
            out = col[:, pmax - p:pmax - p + h, :]
            for i in range(pmax - p + 1, pmax + p + 1):
                out = jnp.maximum(out, col[:, i:i + h, :])
            o_ref[...] = out.astype(o_ref.dtype)
    return kernel


def spp_maxpools(planes, ks):
    """planes: (P, H, W) -> tuple of (P, H, W) max-pooled maps, one per k."""
    p_cnt, h, w = planes.shape
    pmax = max(ks) // 2
    xp = jnp.pad(planes, ((0, 0), (pmax, pmax), (pmax, pmax)),
                 constant_values=-jnp.inf)
    hp, wp = h + 2 * pmax, w + 2 * pmax

    per_plane = hp * wp + (len(ks) + 3) * h * w     # in + outs + intermediates
    tp = int(max(1, min(p_cnt, 8, 1_000_000 // max(per_plane, 1))))
    grid = (pl.cdiv(p_cnt, tp),)

    if tuple(ks) == (5, 9, 13):
        kernel = _make_spp_kernel_5_9_13(h, w)
    else:
        kernel = _make_spp_kernel_generic(tuple(ks), h, w, pmax)

    return pl.pallas_call(
        kernel,
        out_shape=tuple(jax.ShapeDtypeStruct((p_cnt, h, w), planes.dtype)
                        for _ in ks),
        grid_spec=pl.GridSpec(
            grid=grid,
            in_specs=[pl.BlockSpec((tp, hp, wp), lambda i: (i, 0, 0))],
            out_specs=tuple(pl.BlockSpec((tp, h, w), lambda i: (i, 0, 0))
                            for _ in ks),
        ),
        compiler_params=pltpu.CompilerParams(
            dimension_semantics=("parallel",),
        ),
    )(xp)


# ---------------------------------------------------------------------------
# DMTE forward (kernels + layout glue).
# ---------------------------------------------------------------------------
# TODO(synk): training-mode BatchNorm (batch statistics) is not implemented;
#             BN is folded with eval-mode running stats, as in deployment.
def fold_conv_bn(w, gamma, beta, mean, var, eps=BN_EPS):
    scale = gamma / jnp.sqrt(var + eps)
    return w * scale[:, None], beta - mean * scale


def dmte_forward(x_nchw, params, ks=(5, 9, 13)):
    n, c1, h, w = x_nchw.shape
    m = n * h * w
    w1f, b1f = fold_conv_bn(params["w1"], params["g1"], params["b1"],
                            params["m1"], params["v1"])
    w2f, b2f = fold_conv_bn(params["w2"], params["g2"], params["b2"],
                            params["m2"], params["v2"])
    c_ = w1f.shape[0]
    c2 = w2f.shape[0]

    # cv1 on channels-first, lane-dense layout (C1, N*H*W).
    x_cm = jnp.transpose(x_nchw, (1, 0, 2, 3)).reshape(c1, m)
    y1_cm = conv1x1_bn_silu([x_cm], [w1f], b1f)                  # (C_, M)

    # Three stride-1 "same" max pools fused into one Pallas kernel.
    planes = y1_cm.reshape(c_ * n, h, w)
    pooled = spp_maxpools(planes, ks)                            # len(ks) x (C_*N, H, W)
    branch_cm = [y1_cm] + [p.reshape(c_, m) for p in pooled]

    # cv2 consumes the branches directly (no HBM concat); w2 is split along
    # its input-channel axis to match torch.cat([x, m5, m9, m13], 1).
    w2_parts = [w2f[:, i * c_:(i + 1) * c_] for i in range(len(branch_cm))]
    y2_cm = conv1x1_bn_silu(branch_cm, w2_parts, b2f)            # (C2, M)
    return jnp.transpose(y2_cm.reshape(c2, n, h, w), (1, 0, 2, 3))


# ---------------------------------------------------------------------------
# Pure-JAX reference of the same forward pass.
# ---------------------------------------------------------------------------
def _silu(y):
    return y * (1.0 / (1.0 + jnp.exp(-y)))


def _ref_conv_bn_silu(x_nchw, w, gamma, beta, mean, var, eps=BN_EPS):
    y = jnp.einsum("oc,nchw->nohw", w, x_nchw,
                   precision=lax.Precision.HIGHEST)
    inv = (gamma / jnp.sqrt(var + eps))[None, :, None, None]
    y = (y - mean[None, :, None, None]) * inv + beta[None, :, None, None]
    return _silu(y)


def _ref_maxpool(x, k):
    p = k // 2
    return lax.reduce_window(x, -jnp.inf, lax.max,
                             window_dimensions=(1, 1, k, k),
                             window_strides=(1, 1, 1, 1),
                             padding=((0, 0), (0, 0), (p, p), (p, p)))


def dmte_reference(x, params, ks=(5, 9, 13)):
    y1 = _ref_conv_bn_silu(x, params["w1"], params["g1"], params["b1"],
                           params["m1"], params["v1"])
    cat = jnp.concatenate([y1] + [_ref_maxpool(y1, k) for k in ks], axis=1)
    return _ref_conv_bn_silu(cat, params["w2"], params["g2"], params["b2"],
                             params["m2"], params["v2"])


if __name__ == "__main__":
    key = jax.random.PRNGKey(0)
    n, c1, h, w = 2, 4, 16, 16
    c2 = 8
    ks = (5, 9, 13)
    c_ = c1 // 2

    keys = jax.random.split(key, 11)
    x = jax.random.normal(keys[0], (n, c1, h, w), jnp.float32)

    params = dict(
        w1=jax.random.normal(keys[1], (c_, c1), jnp.float32) * 0.5,
        g1=jax.random.uniform(keys[2], (c_,), jnp.float32, 0.5, 1.5),
        b1=jax.random.normal(keys[3], (c_,), jnp.float32) * 0.1,
        m1=jax.random.normal(keys[4], (c_,), jnp.float32) * 0.1,
        v1=jax.random.uniform(keys[5], (c_,), jnp.float32, 0.5, 1.5),
        w2=jax.random.normal(keys[6], (c2, 4 * c_), jnp.float32) * 0.3,
        g2=jax.random.uniform(keys[7], (c2,), jnp.float32, 0.5, 1.5),
        b2=jax.random.normal(keys[8], (c2,), jnp.float32) * 0.1,
        m2=jax.random.normal(keys[9], (c2,), jnp.float32) * 0.1,
        v2=jax.random.uniform(keys[10], (c2,), jnp.float32, 0.5, 1.5),
    )

    fwd = jax.jit(lambda xx, pp: dmte_forward(xx, pp, ks))
    out = jax.block_until_ready(fwd(x, params))
    ref = jax.block_until_ready(dmte_reference(x, params, ks))

    assert out.shape == (n, c2, h, w), out.shape
    assert out.dtype == x.dtype
    # Tolerance covers possible MXU vs XLA f32-matmul precision differences.
    max_err = float(jnp.max(jnp.abs(out - ref)))
    assert max_err < 2e-2, f"max abs err {max_err}"
    print("KERNEL_OK")
</pallas_src>

<mosaic_0001>
module attributes {stable_mosaic.version = 11 : i64} {
  func.func @kernel(%arg0: i32, %arg1: memref<8x512xf32, #tpu.memory_space<vmem>>, %arg2: memref<8x8xf32, #tpu.memory_space<vmem>>, %arg3: memref<8x1xf32, #tpu.memory_space<vmem>>, %arg4: memref<8x512xf32, #tpu.memory_space<vmem>>) attributes {dimension_semantics = [#tpu.dimension_semantics<parallel>], iteration_bounds = array<i64: 1>, scalar_prefetch = 0 : i64, scratch_operands = 0 : i64, tpu.core_type = #tpu.core_type<tc>, window_params = [{transform_indices = @transform_0, window_bounds = array<i64: 8, 512>}, {pipeline_mode = #tpu.pipeline_mode<synchronous>, transform_indices = @transform_1, window_bounds = array<i64: 8, 8>}, {pipeline_mode = #tpu.pipeline_mode<synchronous>, transform_indices = @transform_2, window_bounds = array<i64: 8, 1>}, {transform_indices = @transform_3, window_bounds = array<i64: 8, 512>}]} {
    %c0 = arith.constant 0 : index
    %c0_0 = arith.constant 0 : index
    %0 = vector.load %arg2[%c0, %c0_0] : memref<8x8xf32, #tpu.memory_space<vmem>>, vector<8x8xf32>
    %c0_1 = arith.constant 0 : index
    %c0_2 = arith.constant 0 : index
    %1 = vector.load %arg1[%c0_1, %c0_2] : memref<8x512xf32, #tpu.memory_space<vmem>>, vector<8x512xf32>
    %cst = arith.constant dense<0.000000e+00> : vector<8x512xf32>
    %2 = tpu.matmul %0, %1, %cst {dimension_numbers = #tpu.dot_dimension_numbers<[1], [0], [0], [1], [0, 0, 1, 1], [], []>} : vector<8x8xf32>, vector<8x512xf32>, vector<8x512xf32> -> vector<8x512xf32>
    %c0_3 = arith.constant 0 : index
    %c0_4 = arith.constant 0 : index
    %3 = vector.load %arg3[%c0_3, %c0_4] : memref<8x1xf32, #tpu.memory_space<vmem>>, vector<8x1xf32>
    %4 = vector.broadcast %3 : vector<8x1xf32> to vector<8x512xf32>
    %5 = arith.addf %2, %4 : vector<8x512xf32>
    %cst_5 = arith.constant 0.000000e+00 : f32
    %6 = vector.broadcast %cst_5 : f32 to vector<8x512xf32>
    %7 = arith.subf %6, %5 : vector<8x512xf32>
    %8 = math.exp %7 : vector<8x512xf32>
    %cst_6 = arith.constant 1.000000e+00 : f32
    %9 = vector.broadcast %cst_6 : f32 to vector<8x512xf32>
    %10 = arith.addf %9, %8 : vector<8x512xf32>
    %cst_7 = arith.constant 1.000000e+00 : f32
    %11 = vector.broadcast %cst_7 : f32 to vector<8x512xf32>
    %12 = arith.divf %11, %10 : vector<8x512xf32>
    %13 = arith.mulf %5, %12 : vector<8x512xf32>
    %c0_8 = arith.constant 0 : index
    %c0_9 = arith.constant 0 : index
    %14 = vector.load %arg4[%c0_8, %c0_9] : memref<8x512xf32, #tpu.memory_space<vmem>>, vector<8x512xf32>
    tpu.vector_store %arg4[%c0_8, %c0_9], %13 {strides = array<i32>} : memref<8x512xf32, #tpu.memory_space<vmem>>, vector<8x512xf32>,
    return
  }
  func.func @transform_0(%arg0: i32) -> (i32, i32) {
    %c0_i32 = arith.constant 0 : i32
    %c0_i32_0 = arith.constant 0 : i32
    return %c0_i32, %arg0 : i32, i32
  }
  func.func @transform_1(%arg0: i32) -> (i32, i32) {
    %c0_i32 = arith.constant 0 : i32
    %c0_i32_0 = arith.constant 0 : i32
    %c0_i32_1 = arith.constant 0 : i32
    return %c0_i32, %c0_i32_0 : i32, i32
  }
  func.func @transform_2(%arg0: i32) -> (i32, i32) {
    %c0_i32 = arith.constant 0 : i32
    %c0_i32_0 = arith.constant 0 : i32
    %c0_i32_1 = arith.constant 0 : i32
    return %c0_i32, %c0_i32_0 : i32, i32
  }
  func.func @transform_3(%arg0: i32) -> (i32, i32) {
    %c0_i32 = arith.constant 0 : i32
    %c0_i32_0 = arith.constant 0 : i32
    return %c0_i32, %arg0 : i32, i32
  }
}

module attributes {stable_mosaic.version = 11 : i64} {
  func.func @kernel(%arg0: i32, %arg1: memref<4x28x28xf32, #tpu.memory_space<vmem>>, %arg2: memref<4x16x16xf32, #tpu.memory_space<vmem>>, %arg3: memref<4x16x16xf32, #tpu.memory_space<vmem>>, %arg4: memref<4x16x16xf32, #tpu.memory_space<vmem>>) attributes {dimension_semantics = [#tpu.dimension_semantics<parallel>], iteration_bounds = array<i64: 1>, scalar_prefetch = 0 : i64, scratch_operands = 0 : i64, tpu.core_type = #tpu.core_type<tc>, window_params = [{transform_indices = @transform_0, window_bounds = array<i64: 4, 28, 28>}, {transform_indices = @transform_1, window_bounds = array<i64: 4, 16, 16>}, {transform_indices = @transform_2, window_bounds = array<i64: 4, 16, 16>}, {transform_indices = @transform_3, window_bounds = array<i64: 4, 16, 16>}]} {
    %c0 = arith.constant 0 : index
    %c0_0 = arith.constant 0 : index
    %c0_1 = arith.constant 0 : index
    %0 = vector.load %arg1[%c0, %c0_0, %c0_1] : memref<4x28x28xf32, #tpu.memory_space<vmem>>, vector<4x28x28xf32>
    %1 = vector.extract_strided_slice %0 {offsets = [0, 0, 0], sizes = [4, 28, 24], strides = [1, 1, 1]} : vector<4x28x28xf32> to vector<4x28x24xf32>
    %2 = vector.extract_strided_slice %0 {offsets = [0, 0, 1], sizes = [4, 28, 24], strides = [1, 1, 1]} : vector<4x28x28xf32> to vector<4x28x24xf32>
    %3 = arith.maximumf %1, %2 : vector<4x28x24xf32>
    %4 = vector.extract_strided_slice %0 {offsets = [0, 0, 2], sizes = [4, 28, 24], strides = [1, 1, 1]} : vector<4x28x28xf32> to vector<4x28x24xf32>
    %5 = arith.maximumf %3, %4 : vector<4x28x24xf32>
    %6 = vector.extract_strided_slice %0 {offsets = [0, 0, 3], sizes = [4, 28, 24], strides = [1, 1, 1]} : vector<4x28x28xf32> to vector<4x28x24xf32>
    %7 = arith.maximumf %5, %6 : vector<4x28x24xf32>
    %8 = vector.extract_strided_slice %0 {offsets = [0, 0, 4], sizes = [4, 28, 24], strides = [1, 1, 1]} : vector<4x28x28xf32> to vector<4x28x24xf32>
    %9 = arith.maximumf %7, %8 : vector<4x28x24xf32>
    %10 = vector.extract_strided_slice %9 {offsets = [0, 0, 0], sizes = [4, 28, 20], strides = [1, 1, 1]} : vector<4x28x24xf32> to vector<4x28x20xf32>
    %11 = vector.extract_strided_slice %9 {offsets = [0, 0, 4], sizes = [4, 28, 20], strides = [1, 1, 1]} : vector<4x28x24xf32> to vector<4x28x20xf32>
    %12 = arith.maximumf %10, %11 : vector<4x28x20xf32>
    %13 = vector.extract_strided_slice %12 {offsets = [0, 0, 0], sizes = [4, 28, 16], strides = [1, 1, 1]} : vector<4x28x20xf32> to vector<4x28x16xf32>
    %14 = vector.extract_strided_slice %12 {offsets = [0, 0, 4], sizes = [4, 28, 16], strides = [1, 1, 1]} : vector<4x28x20xf32> to vector<4x28x16xf32>
    %15 = arith.maximumf %13, %14 : vector<4x28x16xf32>
    %16 = vector.extract_strided_slice %9 {offsets = [0, 0, 4], sizes = [4, 28, 16], strides = [1, 1, 1]} : vector<4x28x24xf32> to vector<4x28x16xf32>
    %17 = vector.extract_strided_slice %12 {offsets = [0, 0, 2], sizes = [4, 28, 16], strides = [1, 1, 1]} : vector<4x28x20xf32> to vector<4x28x16xf32>
    %18 = vector.extract_strided_slice %16 {offsets = [0, 4, 0], sizes = [4, 16, 16], strides = [1, 1, 1]} : vector<4x28x16xf32> to vector<4x16x16xf32>
    %19 = vector.extract_strided_slice %16 {offsets = [0, 5, 0], sizes = [4, 16, 16], strides = [1, 1, 1]} : vector<4x28x16xf32> to vector<4x16x16xf32>
    %20 = arith.maximumf %18, %19 : vector<4x16x16xf32>
    %21 = vector.extract_strided_slice %16 {offsets = [0, 6, 0], sizes = [4, 16, 16], strides = [1, 1, 1]} : vector<4x28x16xf32> to vector<4x16x16xf32>
    %22 = arith.maximumf %20, %21 : vector<4x16x16xf32>
    %23 = vector.extract_strided_slice %16 {offsets = [0, 7, 0], sizes = [4, 16, 16], strides = [1, 1, 1]} : vector<4x28x16xf32> to vector<4x16x16xf32>
    %24 = arith.maximumf %22, %23 : vector<4x16x16xf32>
    %25 = vector.extract_strided_slice %16 {offsets = [0, 8, 0], sizes = [4, 16, 16], strides = [1, 1, 1]} : vector<4x28x16xf32> to vector<4x16x16xf32>
    %26 = arith.maximumf %24, %25 : vector<4x16x16xf32>
    %c0_2 = arith.constant 0 : index
    %c0_3 = arith.constant 0 : index
    %c0_4 = arith.constant 0 : index
    %27 = vector.load %arg2[%c0_2, %c0_3, %c0_4] : memref<4x16x16xf32, #tpu.memory_space<vmem>>, vector<4x16x16xf32>
    tpu.vector_store %arg2[%c0_2, %c0_3, %c0_4], %26 {strides = array<i32>} : memref<4x16x16xf32, #tpu.memory_space<vmem>>, vector<4x16x16xf32>,
    %28 = vector.extract_strided_slice %17 {offsets = [0, 2, 0], sizes = [4, 20, 16], strides = [1, 1, 1]} : vector<4x28x16xf32> to vector<4x20x16xf32>
    %29 = vector.extract_strided_slice %17 {offsets = [0, 3, 0], sizes = [4, 20, 16], strides = [1, 1, 1]} : vector<4x28x16xf32> to vector<4x20x16xf32>
    %30 = arith.maximumf %28, %29 : vector<4x20x16xf32>
    %31 = vector.extract_strided_slice %17 {offsets = [0, 4, 0], sizes = [4, 20, 16], strides = [1, 1, 1]} : vector<4x28x16xf32> to vector<4x20x16xf32>
    %32 = arith.maximumf %30, %31 : vector<4x20x16xf32>
    %33 = vector.extract_strided_slice %17 {offsets = [0, 5, 0], sizes = [4, 20, 16], strides = [1, 1, 1]} : vector<4x28x16xf32> to vector<4x20x16xf32>
    %34 = arith.maximumf %32, %33 : vector<4x20x16xf32>
    %35 = vector.extract_strided_slice %17 {offsets = [0, 6, 0], sizes = [4, 20, 16], strides = [1, 1, 1]} : vector<4x28x16xf32> to vector<4x20x16xf32>
    %36 = arith.maximumf %34, %35 : vector<4x20x16xf32>
    %37 = vector.extract_strided_slice %36 {offsets = [0, 0, 0], sizes = [4, 16, 16], strides = [1, 1, 1]} : vector<4x20x16xf32> to vector<4x16x16xf32>
    %38 = vector.extract_strided_slice %36 {offsets = [0, 4, 0], sizes = [4, 16, 16], strides = [1, 1, 1]} : vector<4x20x16xf32> to vector<4x16x16xf32>
    %39 = arith.maximumf %37, %38 : vector<4x16x16xf32>
    %c0_5 = arith.constant 0 : index
    %c0_6 = arith.constant 0 : index
    %c0_7 = arith.constant 0 : index
    %40 = vector.load %arg3[%c0_5, %c0_6, %c0_7] : memref<4x16x16xf32, #tpu.memory_space<vmem>>, vector<4x16x16xf32>
    tpu.vector_store %arg3[%c0_5, %c0_6, %c0_7], %39 {strides = array<i32>} : memref<4x16x16xf32, #tpu.memory_space<vmem>>, vector<4x16x16xf32>,
    %41 = vector.extract_strided_slice %15 {offsets = [0, 0, 0], sizes = [4, 24, 16], strides = [1, 1, 1]} : vector<4x28x16xf32> to vector<4x24x16xf32>
    %42 = vector.extract_strided_slice %15 {offsets = [0, 1, 0], sizes = [4, 24, 16], strides = [1, 1, 1]} : vector<4x28x16xf32> to vector<4x24x16xf32>
    %43 = arith.maximumf %41, %42 : vector<4x24x16xf32>
    %44 = vector.extract_strided_slice %15 {offsets = [0, 2, 0], sizes = [4, 24, 16], strides = [1, 1, 1]} : vector<4x28x16xf32> to vector<4x24x16xf32>
    %45 = arith.maximumf %43, %44 : vector<4x24x16xf32>
    %46 = vector.extract_strided_slice %15 {offsets = [0, 3, 0], sizes = [4, 24, 16], strides = [1, 1, 1]} : vector<4x28x16xf32> to vector<4x24x16xf32>
    %47 = arith.maximumf %45, %46 : vector<4x24x16xf32>
    %48 = vector.extract_strided_slice %15 {offsets = [0, 4, 0], sizes = [4, 24, 16], strides = [1, 1, 1]} : vector<4x28x16xf32> to vector<4x24x16xf32>
    %49 = arith.maximumf %47, %48 : vector<4x24x16xf32>
    %50 = vector.extract_strided_slice %49 {offsets = [0, 0, 0], sizes = [4, 20, 16], strides = [1, 1, 1]} : vector<4x24x16xf32> to vector<4x20x16xf32>
    %51 = vector.extract_strided_slice %49 {offsets = [0, 4, 0], sizes = [4, 20, 16], strides = [1, 1, 1]} : vector<4x24x16xf32> to vector<4x20x16xf32>
    %52 = arith.maximumf %50, %51 : vector<4x20x16xf32>
    %53 = vector.extract_strided_slice %52 {offsets = [0, 0, 0], sizes = [4, 16, 16], strides = [1, 1, 1]} : vector<4x20x16xf32> to vector<4x16x16xf32>
    %54 = vector.extract_strided_slice %52 {offsets = [0, 4, 0], sizes = [4, 16, 16], strides = [1, 1, 1]} : vector<4x20x16xf32> to vector<4x16x16xf32>
    %55 = arith.maximumf %53, %54 : vector<4x16x16xf32>
    %c0_8 = arith.constant 0 : index
    %c0_9 = arith.constant 0 : index
    %c0_10 = arith.constant 0 : index
    %56 = vector.load %arg4[%c0_8, %c0_9, %c0_10] : memref<4x16x16xf32, #tpu.memory_space<vmem>>, vector<4x16x16xf32>
    tpu.vector_store %arg4[%c0_8, %c0_9, %c0_10], %55 {strides = array<i32>} : memref<4x16x16xf32, #tpu.memory_space<vmem>>, vector<4x16x16xf32>,
    return
  }
  func.func @transform_0(%arg0: i32) -> (i32, i32, i32) {
    %c0_i32 = arith.constant 0 : i32
    %c0_i32_0 = arith.constant 0 : i32
    %c0_i32_1 = arith.constant 0 : i32
    return %arg0, %c0_i32, %c0_i32_0 : i32, i32, i32
  }
  func.func @transform_1(%arg0: i32) -> (i32, i32, i32) {
    %c0_i32 = arith.constant 0 : i32
    %c0_i32_0 = arith.constant 0 : i32
    %c0_i32_1 = arith.constant 0 : i32
    return %arg0, %c0_i32, %c0_i32_0 : i32, i32, i32
  }
  func.func @transform_2(%arg0: i32) -> (i32, i32, i32) {
    %c0_i32 = arith.constant 0 : i32
    %c0_i32_0 = arith.constant 0 : i32
    %c0_i32_1 = arith.constant 0 : i32
    return %arg0, %c0_i32, %c0_i32_0 : i32, i32, i32
  }
  func.func @transform_3(%arg0: i32) -> (i32, i32, i32) {
    %c0_i32 = arith.constant 0 : i32
    %c0_i32_0 = arith.constant 0 : i32
    %c0_i32_1 = arith.constant 0 : i32
    return %arg0, %c0_i32, %c0_i32_0 : i32, i32, i32
  }
}

module attributes {stable_mosaic.version = 11 : i64} {
  func.func @kernel(%arg0: i32, %arg1: memref<8x512xf32, #tpu.memory_space<vmem>>, %arg2: memref<8x512xf32, #tpu.memory_space<vmem>>, %arg3: memref<8x512xf32, #tpu.memory_space<vmem>>, %arg4: memref<8x512xf32, #tpu.memory_space<vmem>>, %arg5: memref<8x8xf32, #tpu.memory_space<vmem>>, %arg6: memref<8x8xf32, #tpu.memory_space<vmem>>, %arg7: memref<8x8xf32, #tpu.memory_space<vmem>>, %arg8: memref<8x8xf32, #tpu.memory_space<vmem>>, %arg9: memref<8x1xf32, #tpu.memory_space<vmem>>, %arg10: memref<8x512xf32, #tpu.memory_space<vmem>>) attributes {dimension_semantics = [#tpu.dimension_semantics<parallel>], iteration_bounds = array<i64: 1>, scalar_prefetch = 0 : i64, scratch_operands = 0 : i64, tpu.core_type = #tpu.core_type<tc>, window_params = [{transform_indices = @transform_0, window_bounds = array<i64: 8, 512>}, {transform_indices = @transform_1, window_bounds = array<i64: 8, 512>}, {transform_indices = @transform_2, window_bounds = array<i64: 8, 512>}, {transform_indices = @transform_3, window_bounds = array<i64: 8, 512>}, {pipeline_mode = #tpu.pipeline_mode<synchronous>, transform_indices = @transform_4, window_bounds = array<i64: 8, 8>}, {pipeline_mode = #tpu.pipeline_mode<synchronous>, transform_indices = @transform_5, window_bounds = array<i64: 8, 8>}, {pipeline_mode = #tpu.pipeline_mode<synchronous>, transform_indices = @transform_6, window_bounds = array<i64: 8, 8>}, {pipeline_mode = #tpu.pipeline_mode<synchronous>, transform_indices = @transform_7, window_bounds = array<i64: 8, 8>}, {pipeline_mode = #tpu.pipeline_mode<synchronous>, transform_indices = @transform_8, window_bounds = array<i64: 8, 1>}, {transform_indices = @transform_9, window_bounds = array<i64: 8, 512>}]} {
    %c0 = arith.constant 0 : index
    %c0_0 = arith.constant 0 : index
    %0 = vector.load %arg5[%c0, %c0_0] : memref<8x8xf32, #tpu.memory_space<vmem>>, vector<8x8xf32>
    %c0_1 = arith.constant 0 : index
    %c0_2 = arith.constant 0 : index
    %1 = vector.load %arg1[%c0_1, %c0_2] : memref<8x512xf32, #tpu.memory_space<vmem>>, vector<8x512xf32>
    %cst = arith.constant dense<0.000000e+00> : vector<8x512xf32>
    %2 = tpu.matmul %0, %1, %cst {dimension_numbers = #tpu.dot_dimension_numbers<[1], [0], [0], [1], [0, 0, 1, 1], [], []>} : vector<8x8xf32>, vector<8x512xf32>, vector<8x512xf32> -> vector<8x512xf32>
    %c0_3 = arith.constant 0 : index
    %c0_4 = arith.constant 0 : index
    %3 = vector.load %arg6[%c0_3, %c0_4] : memref<8x8xf32, #tpu.memory_space<vmem>>, vector<8x8xf32>
    %c0_5 = arith.constant 0 : index
    %c0_6 = arith.constant 0 : index
    %4 = vector.load %arg2[%c0_5, %c0_6] : memref<8x512xf32, #tpu.memory_space<vmem>>, vector<8x512xf32>
    %cst_7 = arith.constant dense<0.000000e+00> : vector<8x512xf32>
    %5 = tpu.matmul %3, %4, %cst_7 {dimension_numbers = #tpu.dot_dimension_numbers<[1], [0], [0], [1], [0, 0, 1, 1], [], []>} : vector<8x8xf32>, vector<8x512xf32>, vector<8x512xf32> -> vector<8x512xf32>
    %6 = arith.addf %2, %5 : vector<8x512xf32>
    %c0_8 = arith.constant 0 : index
    %c0_9 = arith.constant 0 : index
    %7 = vector.load %arg7[%c0_8, %c0_9] : memref<8x8xf32, #tpu.memory_space<vmem>>, vector<8x8xf32>
    %c0_10 = arith.constant 0 : index
    %c0_11 = arith.constant 0 : index
    %8 = vector.load %arg3[%c0_10, %c0_11] : memref<8x512xf32, #tpu.memory_space<vmem>>, vector<8x512xf32>
    %cst_12 = arith.constant dense<0.000000e+00> : vector<8x512xf32>
    %9 = tpu.matmul %7, %8, %cst_12 {dimension_numbers = #tpu.dot_dimension_numbers<[1], [0], [0], [1], [0, 0, 1, 1], [], []>} : vector<8x8xf32>, vector<8x512xf32>, vector<8x512xf32> -> vector<8x512xf32>
    %10 = arith.addf %6, %9 : vector<8x512xf32>
    %c0_13 = arith.constant 0 : index
    %c0_14 = arith.constant 0 : index
    %11 = vector.load %arg8[%c0_13, %c0_14] : memref<8x8xf32, #tpu.memory_space<vmem>>, vector<8x8xf32>
    %c0_15 = arith.constant 0 : index
    %c0_16 = arith.constant 0 : index
    %12 = vector.load %arg4[%c0_15, %c0_16] : memref<8x512xf32, #tpu.memory_space<vmem>>, vector<8x512xf32>
    %cst_17 = arith.constant dense<0.000000e+00> : vector<8x512xf32>
    %13 = tpu.matmul %11, %12, %cst_17 {dimension_numbers = #tpu.dot_dimension_numbers<[1], [0], [0], [1], [0, 0, 1, 1], [], []>} : vector<8x8xf32>, vector<8x512xf32>, vector<8x512xf32> -> vector<8x512xf32>
    %14 = arith.addf %10, %13 : vector<8x512xf32>
    %c0_18 = arith.constant 0 : index
    %c0_19 = arith.constant 0 : index
    %15 = vector.load %arg9[%c0_18, %c0_19] : memref<8x1xf32, #tpu.memory_space<vmem>>, vector<8x1xf32>
    %16 = vector.broadcast %15 : vector<8x1xf32> to vector<8x512xf32>
    %17 = arith.addf %14, %16 : vector<8x512xf32>
    %cst_20 = arith.constant 0.000000e+00 : f32
    %18 = vector.broadcast %cst_20 : f32 to vector<8x512xf32>
    %19 = arith.subf %18, %17 : vector<8x512xf32>
    %20 = math.exp %19 : vector<8x512xf32>
    %cst_21 = arith.constant 1.000000e+00 : f32
    %21 = vector.broadcast %cst_21 : f32 to vector<8x512xf32>
    %22 = arith.addf %21, %20 : vector<8x512xf32>
    %cst_22 = arith.constant 1.000000e+00 : f32
    %23 = vector.broadcast %cst_22 : f32 to vector<8x512xf32>
    %24 = arith.divf %23, %22 : vector<8x512xf32>
    %25 = arith.mulf %17, %24 : vector<8x512xf32>
    %c0_23 = arith.constant 0 : index
    %c0_24 = arith.constant 0 : index
    %26 = vector.load %arg10[%c0_23, %c0_24] : memref<8x512xf32, #tpu.memory_space<vmem>>, vector<8x512xf32>
    tpu.vector_store %arg10[%c0_23, %c0_24], %25 {strides = array<i32>} : memref<8x512xf32, #tpu.memory_space<vmem>>, vector<8x512xf32>,
    return
  }
  func.func @transform_0(%arg0: i32) -> (i32, i32) {
    %c0_i32 = arith.constant 0 : i32
    %c0_i32_0 = arith.constant 0 : i32
    return %c0_i32, %arg0 : i32, i32
  }
  func.func @transform_1(%arg0: i32) -> (i32, i32) {
    %c0_i32 = arith.constant 0 : i32
    %c0_i32_0 = arith.constant 0 : i32
    return %c0_i32, %arg0 : i32, i32
  }
  func.func @transform_2(%arg0: i32) -> (i32, i32) {
    %c0_i32 = arith.constant 0 : i32
    %c0_i32_0 = arith.constant 0 : i32
    return %c0_i32, %arg0 : i32, i32
  }
  func.func @transform_3(%arg0: i32) -> (i32, i32) {
    %c0_i32 = arith.constant 0 : i32
    %c0_i32_0 = arith.constant 0 : i32
    return %c0_i32, %arg0 : i32, i32
  }
  func.func @transform_4(%arg0: i32) -> (i32, i32) {
    %c0_i32 = arith.constant 0 : i32
    %c0_i32_0 = arith.constant 0 : i32
    %c0_i32_1 = arith.constant 0 : i32
    return %c0_i32, %c0_i32_0 : i32, i32
  }
  func.func @transform_5(%arg0: i32) -> (i32, i32) {
    %c0_i32 = arith.constant 0 : i32
    %c0_i32_0 = arith.constant 0 : i32
    %c0_i32_1 = arith.constant 0 : i32
    return %c0_i32, %c0_i32_0 : i32, i32
  }
  func.func @transform_6(%arg0: i32) -> (i32, i32) {
    %c0_i32 = arith.constant 0 : i32
    %c0_i32_0 = arith.constant 0 : i32
    %c0_i32_1 = arith.constant 0 : i32
    return %c0_i32, %c0_i32_0 : i32, i32
  }
  func.func @transform_7(%arg0: i32) -> (i32, i32) {
    %c0_i32 = arith.constant 0 : i32
    %c0_i32_0 = arith.constant 0 : i32
    %c0_i32_1 = arith.constant 0 : i32
    return %c0_i32, %c0_i32_0 : i32, i32
  }
  func.func @transform_8(%arg0: i32) -> (i32, i32) {
    %c0_i32 = arith.constant 0 : i32
    %c0_i32_0 = arith.constant 0 : i32
    %c0_i32_1 = arith.constant 0 : i32
    return %c0_i32, %c0_i32_0 : i32, i32
  }
  func.func @transform_9(%arg0: i32) -> (i32, i32) {
    %c0_i32 = arith.constant 0 : i32
    %c0_i32_0 = arith.constant 0 : i32
    return %c0_i32, %arg0 : i32, i32
  }
}

</mosaic_0001>

<bundles_post_ra>
// kernel: _lambda_.3
= control target key start
LH: loop header
LB: loop body
LE: loop exit
PB: predicated region body
PF: predicated region fallthrough
CT: control target
= control target key end

     0   :  { %v228_v3 = vmov 0.0   ;;  %vm25_vm0 = vcmask 64512   ;;  %v229_v7 = vmov 0   ;;  %s280_s0 = inlined_call_operand.vmem [shape: f32[8,512], index: 0, kind: input, shape index: {}]   ;;  %s281_s1 = inlined_call_operand.vmem [shape: f32[8,8], index: 1, kind: input, shape index: {}]   ;;  %s282_s2 = inlined_call_operand.vmem [shape: f32[8,1], index: 2, kind: input, shape index: {}]   ;;  %s283_s3 = inlined_call_operand.vmem [shape: f32[8,512], index: 3, kind: output, shape index: {}]  }
   0x1   :  { %v16_v0 = vld [vmem:[%s280_s0 + $0x8] sm:$0xff]  ;;  %v18_v1 = vld [vmem:[%s280_s0 + $0x18] sm:$0xff]  ;;  %v15_v2 = vld [vmem:[%s280_s0] sm:$0xff]  ;;  %93 = vmatprep.mubr.f32.mxu0 %v228_v3  ;;  %164 = vmatprep.mubr.f32.mxu1 %v228_v3 }
   0x2   :  { %29 = vmatprep.subr.mxu0 %v16_v0  ;;  %100 = vmatprep.subr.mxu1 %v18_v1  ;;  %v17_v4 = vld [vmem:[%s280_s0 + $0x10] sm:$0xff]  ;;  %v14_v5 = vld [vmem:[%s281_s1] sm:$0xff] }
   0x3   :  { %30 = vmatpush1.msra.mxu0 %v15_v2  ;;  %101 = vmatpush1.msra.mxu1 %v17_v4  ;;  %v19_v6 = vld [vmem:[%s282_s2] sm:$0xff] }
   0x4   :  { %207 = vmatmul.mubr.msk.f32.vlgmr.msra.gmra.mrb[0].mxu0 %vm25_vm0, %v14_v5  ;;  %208 = vmatmul.mubr.msk.f32.vlgmr.msra.gmra.mrb[0].mxu1 %vm25_vm0, %v14_v5 }
   0x5   :  { %211 = vset.pattern.permute.xlu0 %v229_v7 }
   0x6   :  { %22 = vperm.xlu0 %211, %v19_v6  }
  0x85   :  { %v23_v8 = vpop.permute.xlu0 %22 }
  0xd7   :  { %v95_v9 = vpop.f32.mrb[0].mxu0  ;;  %v166_v10 = vpop.f32.mrb[0].mxu1 }
  0xd8   :  { %v96_v11 = vadd.f32 %v95_v9, %v23_v8  ;;  %v167_v12 = vadd.f32 %v166_v10, %v23_v8  ;;  %v97_v13 = vpop.f32.mrb[1].mxu0  ;;  %v168_v14 = vpop.f32.mrb[1].mxu1 }
  0xd9   :  { %v98_v15 = vadd.f32 %v97_v13, %v23_v8  ;;  %v169_v16 = vadd.f32 %v168_v14, %v23_v8 }
  0xda   :  { %v171_v17 = vsub.f32 0.0, %v96_v11  ;;  %v173_v18 = vsub.f32 0.0, %v167_v12 }
  0xdb   :  { %v172_v19 = vsub.f32 0.0, %v98_v15  ;;  %v174_v20 = vsub.f32 0.0, %v169_v16 }
  0xdc   :  { %v175_v21 = vmul.f32 1.442695, %v171_v17  ;;  %v179_v22 = vmul.f32 1.442695, %v173_v18 }
  0xdd   :  { %v177_v23 = vmul.f32 1.442695, %v172_v19  ;;  %v181_v24 = vmul.f32 1.442695, %v174_v20 }
  0xde   :  { %212 = vpow2.f32 %v175_v21 }
  0xdf   :  { %214 = vpow2.f32 %v179_v22 }
  0xe0   :  { %216 = vpow2.f32 %v177_v23 }
  0xe1   :  { %218 = vpow2.f32 %v181_v24 }
  0xe8   :  { %v213_v25 = vpop.eup %212 }
  0xe9   :  { %v215_v26 = vpop.eup %214  ;;  %v183_v27 = vadd.f32 1.0, %v213_v25 }
  0xea   :  { %v217_v28 = vpop.eup %216  ;;  %v185_v29 = vadd.f32 1.0, %v215_v26 }
  0xeb   :  { %v219_v30 = vpop.eup %218  ;;  %220 = vrcp.f32 %v183_v27  ;;  %v184_v31 = vadd.f32 1.0, %v217_v28 }
  0xec   :  { %222 = vrcp.f32 %v185_v29  ;;  %v186_v32 = vadd.f32 1.0, %v219_v30 }
  0xed   :  { %224 = vrcp.f32 %v184_v31 }
  0xee   :  { %226 = vrcp.f32 %v186_v32 }
  0xf5   :  { %v221_v33 = vpop.eup %220 }
  0xf6   :  { %v223_v34 = vpop.eup %222  ;;  %v195_v35 = vmul.f32 %v221_v33, %v96_v11 }
  0xf7   :  { %v225_v36 = vpop.eup %224  ;;  %v197_v37 = vmul.f32 %v223_v34, %v167_v12 }
  0xf8   :  { %v227_v38 = vpop.eup %226  ;;  %199 = vst [vmem:[%s283_s3] sm:$0xff] %v195_v35  ;;  %v196_v39 = vmul.f32 %v225_v36, %v98_v15 }
  0xf9   :  { %201 = vst [vmem:[%s283_s3 + $0x10] sm:$0xff] %v197_v37  ;;  %v198_v40 = vmul.f32 %v227_v38, %v169_v16 }
  0xfa   :  { %200 = vst [vmem:[%s283_s3 + $0x8] sm:$0xff] %v196_v39 }
  0xfb   :  { %202 = vst [vmem:[%s283_s3 + $0x18] sm:$0xff] %v198_v40 }

// kernel: _lambda_.5
= control target key start
LH: loop header
LB: loop body
LE: loop exit
PB: predicated region body
PF: predicated region fallthrough
CT: control target
= control target key end

     0   :  { %v726_v3 = vmov 0.0   ;;  %vm42_vm0 = vcmask 64512   ;;  %v727_v14 = vmov 0   ;;  %s861_s1 = inlined_call_operand.vmem [shape: f32[8,512], index: 1, kind: input, shape index: {}]   ;;  %s862_s5 = inlined_call_operand.vmem [shape: f32[8,8], index: 5, kind: input, shape index: {}]   ;;  %s863_s0 = inlined_call_operand.vmem [shape: f32[8,512], index: 0, kind: input, shape index: {}]   ;;  %s864_s2 = inlined_call_operand.vmem [shape: f32[8,512], index: 2, kind: input, shape index: {}]   ;;  %s865_s8 = inlined_call_operand.vmem [shape: f32[8,1], index: 8, kind: input, shape index: {}]   ;;  %s866_s4 = inlined_call_operand.vmem [shape: f32[8,8], index: 4, kind: input, shape index: {}]   ;;  %s867_s3 = inlined_call_operand.vmem [shape: f32[8,512], index: 3, kind: input, shape index: {}]   ;;  %s868_s6 = inlined_call_operand.vmem [shape: f32[8,8], index: 6, kind: input, shape index: {}]   ;;  %s869_s7 = inlined_call_operand.vmem [shape: f32[8,8], index: 7, kind: input, shape index: {}]   ;;  %s870_s9 = inlined_call_operand.vmem [shape: f32[8,512], index: 9, kind: output, shape index: {}]  }
   0x1   :  { %v39_v0 = vld [vmem:[%s861_s1 + $0x8] sm:$0xff]  ;;  %v41_v1 = vld [vmem:[%s861_s1 + $0x18] sm:$0xff]  ;;  %v38_v2 = vld [vmem:[%s861_s1] sm:$0xff]  ;;  %110 = vmatprep.mubr.f32.mxu0 %v726_v3  ;;  %181 = vmatprep.mubr.f32.mxu1 %v726_v3 }
   0x2   :  { %46 = vmatprep.subr.mxu0 %v39_v0  ;;  %117 = vmatprep.subr.mxu1 %v41_v1  ;;  %v40_v4 = vld [vmem:[%s861_s1 + $0x10] sm:$0xff]  ;;  %v37_v5 = vld [vmem:[%s862_s5] sm:$0xff]  ;;  %v34_v6 = vld [vmem:[%s863_s0 + $0x8] sm:$0xff] }
   0x3   :  { %47 = vmatpush1.msra.mxu0 %v38_v2  ;;  %118 = vmatpush1.msra.mxu1 %v40_v4  ;;  %v36_v7 = vld [vmem:[%s863_s0 + $0x18] sm:$0xff]  ;;  %v33_v8 = vld [vmem:[%s863_s0] sm:$0xff]  ;;  %v35_v9 = vld [vmem:[%s863_s0 + $0x10] sm:$0xff] }
   0x4   :  { %687 = vmatmul.mubr.msk.f32.vlgmr.msra.gmra.mrb[0].mxu0 %vm42_vm0, %v37_v5  ;;  %688 = vmatmul.mubr.msk.f32.vlgmr.msra.gmra.mrb[0].mxu1 %vm42_vm0, %v37_v5  ;;  %v335_v10 = vld [vmem:[%s864_s2 + $0x8] sm:$0xff]  ;;  %v337_v11 = vld [vmem:[%s864_s2 + $0x18] sm:$0xff]  ;;  %v641_v12 = vld [vmem:[%s865_s8] sm:$0xff] }
   0x5   :  { %191 = vmatprep.subr.mxu0 %v34_v6  ;;  %262 = vmatprep.subr.mxu1 %v36_v7  ;;  %v32_v13 = vld [vmem:[%s866_s4] sm:$0xff]  ;;  %v336_v16 = vld [vmem:[%s864_s2 + $0x10] sm:$0xff]  ;;  %v489_v17 = vld [vmem:[%s867_s3 + $0x8] sm:$0xff] }
   0x6   :  { %192 = vmatpush1.msra.mxu0 %v33_v8  ;;  %263 = vmatpush1.msra.mxu1 %v35_v9  ;;  %v334_v15 = vld [vmem:[%s864_s2] sm:$0xff]  ;;  %v491_v18 = vld [vmem:[%s867_s3 + $0x18] sm:$0xff]  ;;  %v490_v21 = vld [vmem:[%s867_s3 + $0x10] sm:$0xff] }
   0x7   :  { %255 = vmatprep.mubr.f32.mxu0 %v726_v3  ;;  %326 = vmatprep.mubr.f32.mxu1 %v726_v3  ;;  %v333_v19 = vld [vmem:[%s868_s6] sm:$0xff] }
   0x8   :  { %341 = vmatprep.subr.mxu0 %v335_v10  ;;  %412 = vmatprep.subr.mxu1 %v337_v11  ;;  %v488_v20 = vld [vmem:[%s867_s3] sm:$0xff] }
   0x9   :  { %709 = vset.pattern.permute.xlu0 %v727_v14  ;;  %v487_v22 = vld [vmem:[%s869_s7] sm:$0xff] }
   0xa   :  { %644 = vperm.xlu0 %709, %v641_v12  }
   0xc   :  { %689 = vmatmul.mubr.msk.f32.vlgmr.msra.gmra.mrb[0].mxu0 %vm42_vm0, %v32_v13  ;;  %690 = vmatmul.mubr.msk.f32.vlgmr.msra.gmra.mrb[0].mxu1 %vm42_vm0, %v32_v13 }
   0xd   :  { %342 = vmatpush1.msra.mxu0 %v334_v15  ;;  %413 = vmatpush1.msra.mxu1 %v336_v16 }
   0xe   :  { %405 = vmatprep.mubr.f32.mxu0 %v726_v3  ;;  %476 = vmatprep.mubr.f32.mxu1 %v726_v3 }
   0xf   :  { %495 = vmatprep.subr.mxu0 %v489_v17  ;;  %566 = vmatprep.subr.mxu1 %v491_v18 }
  0x14   :  { %691 = vmatmul.mubr.msk.f32.vlgmr.msra.gmra.mrb[0].mxu0 %vm42_vm0, %v333_v19  ;;  %692 = vmatmul.mubr.msk.f32.vlgmr.msra.gmra.mrb[0].mxu1 %vm42_vm0, %v333_v19 }
  0x15   :  { %496 = vmatpush1.msra.mxu0 %v488_v20  ;;  %567 = vmatpush1.msra.mxu1 %v490_v21 }
  0x16   :  { %559 = vmatprep.mubr.f32.mxu0 %v726_v3  ;;  %630 = vmatprep.mubr.f32.mxu1 %v726_v3 }
  0x1c   :  { %693 = vmatmul.mubr.msk.f32.vlgmr.msra.gmra.mrb[0].mxu0 %vm42_vm0, %v487_v22  ;;  %694 = vmatmul.mubr.msk.f32.vlgmr.msra.gmra.mrb[0].mxu1 %vm42_vm0, %v487_v22 }
  0x89   :  { %v645_v23 = vpop.permute.xlu0 %644 }
  0xef   :  { %v561_v24 = vpop.f32.mrb[0].mxu0  ;;  %v632_v25 = vpop.f32.mrb[0].mxu1 }
  0xf0   :  { %v647_v26 = vadd.f32 %v645_v23, %v561_v24  ;;  %v649_v27 = vadd.f32 %v645_v23, %v632_v25  ;;  %v563_v28 = vpop.f32.mrb[1].mxu0  ;;  %v634_v29 = vpop.f32.mrb[1].mxu1 }
  0xf1   :  { %v648_v30 = vadd.f32 %v645_v23, %v563_v28  ;;  %v650_v31 = vadd.f32 %v645_v23, %v634_v29 }
  0xf2   :  { %v651_v32 = vsub.f32 0.0, %v647_v26  ;;  %v653_v33 = vsub.f32 0.0, %v649_v27 }
  0xf3   :  { %v652_v34 = vsub.f32 0.0, %v648_v30  ;;  %v654_v35 = vsub.f32 0.0, %v650_v31 }
  0xf4   :  { %v655_v36 = vmul.f32 1.442695, %v651_v32  ;;  %v659_v37 = vmul.f32 1.442695, %v653_v33 }
  0xf5   :  { %v657_v38 = vmul.f32 1.442695, %v652_v34  ;;  %v661_v39 = vmul.f32 1.442695, %v654_v35 }
  0xf6   :  { %710 = vpow2.f32 %v655_v36 }
  0xf7   :  { %712 = vpow2.f32 %v659_v37 }
  0xf8   :  { %714 = vpow2.f32 %v657_v38 }
  0xf9   :  { %716 = vpow2.f32 %v661_v39 }
 0x100   :  { %v711_v40 = vpop.eup %710 }
 0x101   :  { %v713_v41 = vpop.eup %712  ;;  %v663_v42 = vadd.f32 1.0, %v711_v40 }
 0x102   :  { %v715_v43 = vpop.eup %714  ;;  %v665_v44 = vadd.f32 1.0, %v713_v41 }
 0x103   :  { %v717_v45 = vpop.eup %716  ;;  %718 = vrcp.f32 %v663_v42  ;;  %v664_v46 = vadd.f32 1.0, %v715_v43 }
 0x104   :  { %720 = vrcp.f32 %v665_v44  ;;  %v666_v47 = vadd.f32 1.0, %v717_v45 }
 0x105   :  { %722 = vrcp.f32 %v664_v46 }
 0x106   :  { %724 = vrcp.f32 %v666_v47 }
 0x10d   :  { %v719_v48 = vpop.eup %718 }
 0x10e   :  { %v721_v49 = vpop.eup %720  ;;  %v675_v50 = vmul.f32 %v719_v48, %v647_v26 }
 0x10f   :  { %v723_v51 = vpop.eup %722  ;;  %v677_v52 = vmul.f32 %v721_v49, %v649_v27 }
 0x110   :  { %v725_v53 = vpop.eup %724  ;;  %679 = vst [vmem:[%s870_s9] sm:$0xff] %v675_v50  ;;  %v676_v54 = vmul.f32 %v723_v51, %v648_v30 }
 0x111   :  { %681 = vst [vmem:[%s870_s9 + $0x10] sm:$0xff] %v677_v52  ;;  %v678_v55 = vmul.f32 %v725_v53, %v650_v31 }
 0x112   :  { %680 = vst [vmem:[%s870_s9 + $0x8] sm:$0xff] %v676_v54 }
 0x113   :  { %682 = vst [vmem:[%s870_s9 + $0x18] sm:$0xff] %v678_v55 }

// kernel: _lambda_.4
= control target key start
LH: loop header
LB: loop body
LE: loop exit
PB: predicated region body
PF: predicated region fallthrough
CT: control target
= control target key end

     0   :  { %s1356_s16 = smov 127   ;;  %s1357_s19 = smov 126   ;;  %vm459_vm0 = vcmask 1046528   ;;  %vm504_vm1 = vcmask 1045504   ;;  %vm549_vm2 = vcmask 1044480   ;;  %vm594_vm3 = vcmask 1043456   ;;  %s2385_s0 = inlined_call_operand.vmem [shape: f32[4,28,28], index: 0, kind: input, shape index: {}]   ;;  %s2386_s1 = inlined_call_operand.vmem [shape: f32[4,16,16], index: 1, kind: output, shape index: {0}]   ;;  %s2387_s3 = inlined_call_operand.vmem [shape: f32[4,16,16], index: 3, kind: output, shape index: {2}]   ;;  %s2388_s2 = inlined_call_operand.vmem [shape: f32[4,16,16], index: 2, kind: output, shape index: {1}]  }
   0x1   :  { %v1383_v0 = vld [vmem:[%s2385_s0 + $0x10] sm:$0xff]  ;;  %v1388_v1 = vld [vmem:[%s2385_s0] sm:$0xff]  ;;  %v1395_v2 = vld [vmem:[%s2385_s0 + $0x18] sm:$0xf]  ;;  %vm681_vm4 = vcmask 130048   ;;  %vm679_vm5 = vcmask 130052  }
   0x2   :  { %47 = vrot.lane.b32.xlu1 %v1383_v0, %s1356_s16  ;;  %43 = vrot.lane.b32.xlu0 %v1388_v1, %s1356_s16  ;;  %v1400_v3 = vld [vmem:[%s2385_s0 + $0x8] sm:$0xff]  ;;  %v1412_v5 = vld [vmem:[%s2385_s0 + $0x20] sm:$0xff]  ;;  %vm683_vm6 = vcmask 125952   ;;  %vm993_vm7 = vcmask 123904   ;;  %vm990_vm8 = vcmask 130050  }
   0x3   :  { %v1407_v4 = vld [vmem:[%s2385_s0 + $0x28] sm:$0xff]  ;;  %v1419_v6 = vld [vmem:[%s2385_s0 + $0x38] sm:$0xf]  ;;  %v1424_v7 = vld [vmem:[%s2385_s0 + $0x30] sm:$0xff] }
   0x4   :  { %v1431_v8 = vld [vmem:[%s2385_s0 + $0x48] sm:$0xff]  ;;  %v1436_v9 = vld [vmem:[%s2385_s0 + $0x40] sm:$0xff]  ;;  %v1443_v10 = vld [vmem:[%s2385_s0 + $0x58] sm:$0xf] }
   0x5   :  { %v1448_v11 = vld [vmem:[%s2385_s0 + $0x50] sm:$0xff]  ;;  %v1455_v12 = vld [vmem:[%s2385_s0 + $0x68] sm:$0xff]  ;;  %v1460_v13 = vld [vmem:[%s2385_s0 + $0x60] sm:$0xff] }
   0x6   :  { %49 = vrot.lane.b32.xlu1 %v1395_v2, %s1356_s16  ;;  %45 = vrot.lane.b32.xlu0 %v1400_v3, %s1356_s16  ;;  %v1467_v14 = vld [vmem:[%s2385_s0 + $0x78] sm:$0xf]  ;;  %v1472_v15 = vld [vmem:[%s2385_s0 + $0x70] sm:$0xff]  ;;  %s1358_s0 = smov 125  }
   0xa   :  { %53 = vrot.lane.b32.xlu1 %v1407_v4, %s1356_s16  ;;  %51 = vrot.lane.b32.xlu0 %v1412_v5, %s1356_s16 }
   0xe   :  { %57 = vrot.lane.b32.xlu1 %v1419_v6, %s1356_s16  ;;  %55 = vrot.lane.b32.xlu0 %v1424_v7, %s1356_s16 }
  0x12   :  { %61 = vrot.lane.b32.xlu1 %v1431_v8, %s1356_s16  ;;  %59 = vrot.lane.b32.xlu0 %v1436_v9, %s1356_s16 }
  0x16   :  { %65 = vrot.lane.b32.xlu1 %v1443_v10, %s1356_s16  ;;  %63 = vrot.lane.b32.xlu0 %v1448_v11, %s1356_s16 }
  0x1a   :  { %69 = vrot.lane.b32.xlu1 %v1455_v12, %s1356_s16  ;;  %67 = vrot.lane.b32.xlu0 %v1460_v13, %s1356_s16 }
  0x1e   :  { %73 = vrot.lane.b32.xlu1 %v1467_v14, %s1356_s16  ;;  %71 = vrot.lane.b32.xlu0 %v1472_v15, %s1356_s16  ;;  %s1359_s16 = smov 124  }
  0x22   :  { %109 = vrot.lane.b32.xlu1 %v1400_v3, %s1357_s19  ;;  %107 = vrot.lane.b32.xlu0 %v1388_v1, %s1357_s19 }
  0x26   :  { %113 = vrot.lane.b32.xlu1 %v1395_v2, %s1357_s19  ;;  %111 = vrot.lane.b32.xlu0 %v1383_v0, %s1357_s19 }
  0x2a   :  { %117 = vrot.lane.b32.xlu1 %v1407_v4, %s1357_s19  ;;  %115 = vrot.lane.b32.xlu0 %v1412_v5, %s1357_s19 }
  0x2e   :  { %121 = vrot.lane.b32.xlu1 %v1419_v6, %s1357_s19  ;;  %119 = vrot.lane.b32.xlu0 %v1424_v7, %s1357_s19 }
  0x32   :  { %125 = vrot.lane.b32.xlu1 %v1431_v8, %s1357_s19  ;;  %123 = vrot.lane.b32.xlu0 %v1436_v9, %s1357_s19 }
  0x36   :  { %129 = vrot.lane.b32.xlu1 %v1443_v10, %s1357_s19  ;;  %127 = vrot.lane.b32.xlu0 %v1448_v11, %s1357_s19 }
  0x3a   :  { %133 = vrot.lane.b32.xlu1 %v1455_v12, %s1357_s19  ;;  %131 = vrot.lane.b32.xlu0 %v1460_v13, %s1357_s19 }
  0x3e   :  { %137 = vrot.lane.b32.xlu1 %v1467_v14, %s1357_s19  ;;  %135 = vrot.lane.b32.xlu0 %v1472_v15, %s1357_s19 }
  0x42   :  { %173 = vrot.lane.b32.xlu1 %v1400_v3, %s1358_s0  ;;  %171 = vrot.lane.b32.xlu0 %v1388_v1, %s1358_s0 }
  0x46   :  { %177 = vrot.lane.b32.xlu1 %v1395_v2, %s1358_s0  ;;  %175 = vrot.lane.b32.xlu0 %v1383_v0, %s1358_s0 }
  0x4a   :  { %181 = vrot.lane.b32.xlu1 %v1407_v4, %s1358_s0  ;;  %179 = vrot.lane.b32.xlu0 %v1412_v5, %s1358_s0 }
  0x4e   :  { %185 = vrot.lane.b32.xlu1 %v1419_v6, %s1358_s0  ;;  %183 = vrot.lane.b32.xlu0 %v1424_v7, %s1358_s0 }
  0x52   :  { %189 = vrot.lane.b32.xlu1 %v1431_v8, %s1358_s0  ;;  %187 = vrot.lane.b32.xlu0 %v1436_v9, %s1358_s0 }
  0x56   :  { %193 = vrot.lane.b32.xlu1 %v1443_v10, %s1358_s0  ;;  %191 = vrot.lane.b32.xlu0 %v1448_v11, %s1358_s0 }
  0x5a   :  { %197 = vrot.lane.b32.xlu1 %v1455_v12, %s1358_s0  ;;  %195 = vrot.lane.b32.xlu0 %v1460_v13, %s1358_s0 }
  0x5e   :  { %201 = vrot.lane.b32.xlu1 %v1467_v14, %s1358_s0  ;;  %199 = vrot.lane.b32.xlu0 %v1472_v15, %s1358_s0 }
  0x62   :  { %237 = vrot.lane.b32.xlu1 %v1400_v3, %s1359_s16  ;;  %235 = vrot.lane.b32.xlu0 %v1388_v1, %s1359_s16 }
  0x66   :  { %241 = vrot.lane.b32.xlu1 %v1395_v2, %s1359_s16  ;;  %239 = vrot.lane.b32.xlu0 %v1383_v0, %s1359_s16 }
  0x6a   :  { %245 = vrot.lane.b32.xlu1 %v1407_v4, %s1359_s16  ;;  %243 = vrot.lane.b32.xlu0 %v1412_v5, %s1359_s16 }
  0x6e   :  { %249 = vrot.lane.b32.xlu1 %v1419_v6, %s1359_s16  ;;  %247 = vrot.lane.b32.xlu0 %v1424_v7, %s1359_s16 }
  0x72   :  { %253 = vrot.lane.b32.xlu1 %v1431_v8, %s1359_s16  ;;  %251 = vrot.lane.b32.xlu0 %v1436_v9, %s1359_s16 }
  0x74   :  { %v1544_v16 = vpop.permute.xlu1 %47  ;;  %v44_v17 = vpop.permute.xlu0 %43 }
  0x75   :  { %v91_v62 = vmax.f32 %v1388_v1, %v44_v17 }
  0x76   :  { %257 = vrot.lane.b32.xlu1 %v1443_v10, %s1359_s16  ;;  %255 = vrot.lane.b32.xlu0 %v1448_v11, %s1359_s16 }
  0x78   :  { %v50_v18 = vpop.permute.xlu1 %49  ;;  %v46_v19 = vpop.permute.xlu0 %45 }
  0x79   :  { %v92_v63 = vmax.f32 %v1400_v3, %v46_v19 }
  0x7a   :  { %261 = vrot.lane.b32.xlu1 %v1455_v12, %s1359_s16  ;;  %259 = vrot.lane.b32.xlu0 %v1460_v13, %s1359_s16 }
  0x7c   :  { %v1554_v20 = vpop.permute.xlu1 %53  ;;  %v1556_v21 = vpop.permute.xlu0 %51 }
  0x7d   :  { %v96_v17 = vmax.f32 %v1407_v4, %v1554_v20  ;;  %v95_v19 = vmax.f32 %v1412_v5, %v1556_v21 }
  0x7e   :  { %265 = vrot.lane.b32.xlu1 %v1467_v14, %s1359_s16  ;;  %263 = vrot.lane.b32.xlu0 %v1472_v15, %s1359_s16 }
  0x80   :  { %v1562_v22 = vpop.permute.xlu1 %57  ;;  %v1564_v23 = vpop.permute.xlu0 %55 }
  0x81   :  { %v97_v5 = vmax.f32 %v1424_v7, %v1564_v23 }
  0x84   :  { %v1566_v24 = vpop.permute.xlu1 %61  ;;  %v1568_v25 = vpop.permute.xlu0 %59 }
  0x85   :  { %v100_v21 = vmax.f32 %v1431_v8, %v1566_v24 }
  0x88   :  { %v1570_v26 = vpop.permute.xlu1 %65  ;;  %v1572_v27 = vpop.permute.xlu0 %63 }
  0x89   :  { %v101_v8 = vmax.f32 %v1448_v11, %v1572_v27 }
  0x8c   :  { %v1574_v28 = vpop.permute.xlu1 %69  ;;  %v1576_v29 = vpop.permute.xlu0 %67 }
  0x90   :  { %v1578_v30 = vpop.permute.xlu1 %73  ;;  %v1580_v31 = vpop.permute.xlu0 %71 }
  0x91   :  { %v106_v23 = vmax.f32 %v1467_v14, %v1578_v30  ;;  %v105_v11 = vmax.f32 %v1472_v15, %v1580_v31 }
  0x94   :  { %v110_v32 = vpop.permute.xlu1 %109  ;;  %v108_v33 = vpop.permute.xlu0 %107 }
  0x98   :  { %v114_v34 = vpop.permute.xlu1 %113  ;;  %v112_v35 = vpop.permute.xlu0 %111 }
  0x9c   :  { %v118_v36 = vpop.permute.xlu1 %117  ;;  %v116_v37 = vpop.permute.xlu0 %115 }
  0xa0   :  { %v1582_v38 = vpop.permute.xlu1 %121  ;;  %v1584_v39 = vpop.permute.xlu0 %119 }
  0xa4   :  { %v1586_v40 = vpop.permute.xlu1 %125  ;;  %v1588_v41 = vpop.permute.xlu0 %123 }
  0xa8   :  { %v1590_v42 = vpop.permute.xlu1 %129  ;;  %v1592_v43 = vpop.permute.xlu0 %127 }
  0xa9   :  { %2389 = vst [vmem:[#allocation2_spill] sm:$0xff] %v1592_v43 }
  0xac   :  { %v1594_v44 = vpop.permute.xlu1 %133  ;;  %v1596_v45 = vpop.permute.xlu0 %131 }
  0xad   :  { %2390 = vst [vmem:[#allocation3_spill] sm:$0xff] %v1594_v44  ;;  %2391 = vst [vmem:[#allocation4_spill] sm:$0xff] %v1596_v45  ;;  %v156_v45 = vmax.f32 %v92_v63, %v110_v32 }
  0xb0   :  { %v1598_v46 = vpop.permute.xlu1 %137  ;;  %v1600_v47 = vpop.permute.xlu0 %135  ;;  %v2402_v31 = vld [vmem:[#allocation2_spill] sm:$0xff] }
  0xb1   :  { %2392 = vst [vmem:[#allocation5_spill] sm:$0xff] %v1598_v46  ;;  %2393 = vst [vmem:[#allocation6_spill] sm:$0xff] %v1600_v47 }
  0xb4   :  { %v174_v48 = vpop.permute.xlu1 %173  ;;  %v172_v49 = vpop.permute.xlu0 %171 }
  0xb8   :  { %v178_v50 = vpop.permute.xlu1 %177  ;;  %v176_v51 = vpop.permute.xlu0 %175 }
  0xbc   :  { %v182_v52 = vpop.permute.xlu1 %181  ;;  %v180_v53 = vpop.permute.xlu0 %179 }
  0xc0   :  { %v1602_v54 = vpop.permute.xlu1 %185  ;;  %v1604_v55 = vpop.permute.xlu0 %183 }
  0xc1   :  { %2394 = vst [vmem:[#allocation7_spill] sm:$0xff] %v1604_v55 }
  0xc4   :  { %v1606_v56 = vpop.permute.xlu1 %189  ;;  %v1608_v57 = vpop.permute.xlu0 %187 }
  0xc5   :  { %2395 = vst [vmem:[#allocation8_spill] sm:$0xff] %v1606_v56  ;;  %2396 = vst [vmem:[#allocation9_spill] sm:$0xff] %v1608_v57  ;;  %v155_v56 = vmax.f32 %v91_v62, %v108_v33  ;;  %v93_v57 = vmax.f32 %v1383_v0, %v1544_v16  ;;  %v160_v33 = vmax.f32 %v96_v17, %v118_v36 }
  0xc7   :  { %v219_v44 = vmax.f32 %v155_v56, %v172_v49  ;;  %v157_v55 = vmax.f32 %v93_v57, %v112_v35  ;;  %v99_v35 = vmax.f32 %v1436_v9, %v1568_v25  ;;  %v104_v9 = vmax.f32 %v1455_v12, %v1574_v28  ;;  %v2405_v56 = vld [vmem:[#allocation5_spill] sm:$0xff] }
  0xc8   :  { %v1610_v58 = vpop.permute.xlu1 %193  ;;  %v1612_v59 = vpop.permute.xlu0 %191  ;;  %v164_v12 = vmax.f32 %v100_v21, %v1586_v40  ;;  %v2401_v28 = vld [vmem:[#allocation7_spill] sm:$0xff]  ;;  %v1700_v57 = vmax.f32 %v106_v23, %v2405_v56 }
  0xc9   :  { %2397 = vst [vmem:[#allocation10_spill] sm:$0xff] %v1610_v58  ;;  %2398 = vst [vmem:[#allocation11_spill] sm:$0xff] %v1612_v59  ;;  %v94_v58 = vmax.f32 %v1395_v2, %v50_v18  ;;  %v220_v59 = vmax.f32 %v156_v45, %v174_v48  ;;  %v221_v0 = vmax.f32 %v157_v55, %v176_v51 }
  0xca   :  { %v98_v2 = vmax.f32 %v1419_v6, %v1562_v22  ;;  %v102_v6 = vmax.f32 %v1443_v10, %v1570_v26  ;;  %v224_v22 = vmax.f32 %v160_v33, %v182_v52  ;;  %v103_v10 = vmax.f32 %v1460_v13, %v1576_v29 }
  0xcb   :  { %v163_v13 = vmax.f32 %v99_v35, %v1588_v41 }
  0xcc   :  { %v1614_v60 = vpop.permute.xlu1 %197  ;;  %v1616_v61 = vpop.permute.xlu0 %195  ;;  %v162_v26 = vmax.f32 %v98_v2, %v1582_v38  ;;  %v166_v27 = vmax.f32 %v102_v6, %v1590_v42  ;;  %v165_v38 = vmax.f32 %v101_v8, %v2402_v31  ;;  %v2408_v63 = vld [vmem:[#allocation9_spill] sm:$0xff] }
  0xcd   :  { %2399 = vst [vmem:[#allocation12_spill] sm:$0xff] %v1614_v60  ;;  %2400 = vst [vmem:[#allocation13_spill] sm:$0xff] %v1616_v61  ;;  %v158_v61 = vmax.f32 %v94_v58, %v114_v34  ;;  %v159_v34 = vmax.f32 %v95_v19, %v116_v37  ;;  %v2406_v58 = vld [vmem:[#allocation6_spill] sm:$0xff]  ;;  %v227_v17 = vmax.f32 %v163_v13, %v2408_v63 }
  0xce   :  { %v226_v14 = vmax.f32 %v162_v26, %v1602_v54  ;;  %v2404_v54 = vld [vmem:[#allocation4_spill] sm:$0xff] }
  0xcf   :  { %v222_v32 = vmax.f32 %v158_v61, %v178_v50  ;;  %v223_v36 = vmax.f32 %v159_v34, %v180_v53  ;;  %v167_v55 = vmax.f32 %v103_v10, %v2404_v54  ;;  %v2407_v61 = vld [vmem:[#allocation8_spill] sm:$0xff] }
  0xd0   :  { %v1620_v47 = vpop.permute.xlu1 %201  ;;  %v1622_v46 = vpop.permute.xlu0 %199  ;;  %v228_v62 = vmax.f32 %v164_v12, %v2407_v61 }
  0xd4   :  { %v238_v60 = vpop.permute.xlu1 %237  ;;  %v236_v43 = vpop.permute.xlu0 %235  ;;  %v2412_v23 = vld [vmem:[#allocation13_spill] sm:$0xff] }
  0xd5   :  { %v1627_v1 = vmax.f32 %v220_v59, %v238_v60  ;;  %v1629_v3 = vmax.f32 %v219_v44, %v236_v43  ;;  %v161_v43 = vmax.f32 %v97_v5, %v1584_v39  ;;  %v2403_v39 = vld [vmem:[#allocation3_spill] sm:$0xff]  ;;  %v1703_v59 = vmax.f32 %v105_v11, %v2406_v58 }
  0xd6   :  { %v1688_v40 = vmax.f32 %v104_v9, %v2403_v39  ;;  %v2411_v9 = vld [vmem:[#allocation12_spill] sm:$0xff] }
  0xd7   :  { %317 = vrot.lane.b32.xlu1 %v1627_v1, %s1359_s16  ;;  %315 = vrot.lane.b32.xlu0 %v1629_v3, %s1359_s16  ;;  %v461_v37 = vrot.slane %v1627_v1, 1  ;;  %v460_v7 = vrot.slane %v1629_v3, 1  ;;  %v225_v29 = vmax.f32 %v161_v43, %v2401_v28  ;;  %v506_v48 = vrot.slane %v1627_v1, 2 }
  0xd8   :  { %v242_v16 = vpop.permute.xlu1 %241  ;;  %v240_v18 = vpop.permute.xlu0 %239  ;;  %v505_v49 = vrot.slane %v1629_v3, 2  ;;  %v550_v34 = vrot.slane %v1629_v3, 3  ;;  %v232_v10 = vmax.f32 %v1688_v40, %v2411_v9  ;;  %v234_v43 = vmax.f32 %v1700_v57, %v1620_v47 }
  0xd9   :  { %v1641_v4 = vmax.f32 %v222_v32, %v242_v16  ;;  %v1643_v20 = vmax.f32 %v221_v0, %v240_v18  ;;  %v462_v15 = vsel %vm459_vm0, %v460_v7, %v461_v37  ;;  %v2409_v32 = vld [vmem:[#allocation10_spill] sm:$0xff]  ;;  %v551_v18 = vrot.slane %v1627_v1, 3 }
  0xda   :  { %v492_v60 = vmax.f32 %v1629_v3, %v462_v15  ;;  %v230_v0 = vmax.f32 %v166_v27, %v2409_v32  ;;  %v507_v33 = vsel %vm504_vm1, %v505_v49, %v506_v48  ;;  %v595_v13 = vrot.slane %v1627_v1, 4 }
  0xdb   :  { %321 = vrot.lane.b32.xlu1 %v1641_v4, %s1359_s16  ;;  %319 = vrot.lane.b32.xlu0 %v1643_v20, %s1359_s16  ;;  %v463_v30 = vrot.slane %v1643_v20, 1  ;;  %v508_v35 = vrot.slane %v1643_v20, 2  ;;  %v553_v7 = vrot.slane %v1643_v20, 3  ;;  %v552_v31 = vsel %vm549_vm2, %v550_v34, %v551_v18 }
  0xdc   :  { %v246_v24 = vpop.permute.xlu1 %245  ;;  %v244_v25 = vpop.permute.xlu0 %243  ;;  %v537_v8 = vmax.f32 %v492_v60, %v507_v33  ;;  %v596_v39 = vrot.slane %v1643_v20, 4 }
  0xdd   :  { %v1669_v44 = vmax.f32 %v224_v22, %v246_v24  ;;  %v1671_v45 = vmax.f32 %v223_v36, %v244_v25  ;;  %v464_v19 = vsel %vm459_vm0, %v461_v37, %v463_v30  ;;  %v2410_v22 = vld [vmem:[#allocation11_spill] sm:$0xff]  ;;  %v231_v24 = vmax.f32 %v167_v55, %v2412_v23 }
  0xde   :  { %v229_v36 = vmax.f32 %v165_v38, %v2410_v22  ;;  %v493_v37 = vmax.f32 %v1627_v1, %v464_v19  ;;  %v509_v15 = vsel %vm504_vm1, %v506_v48, %v508_v35  ;;  %v554_v47 = vsel %vm549_vm2, %v551_v18, %v553_v7 }
  0xdf   :  { %325 = vrot.lane.b32.xlu1 %v1669_v44, %s1359_s16  ;;  %323 = vrot.lane.b32.xlu0 %v1671_v45, %s1359_s16  ;;  %v465_v52 = vrot.slane %v1671_v45, 1  ;;  %v466_v53 = vrot.slane %v1669_v44, 1  ;;  %v510_v25 = vrot.slane %v1671_v45, 2  ;;  %v511_v26 = vrot.slane %v1669_v44, 2 }
  0xe0   :  { %v250_v41 = vpop.permute.xlu1 %249  ;;  %v248_v42 = vpop.permute.xlu0 %247  ;;  %v538_v38 = vmax.f32 %v493_v37, %v509_v15  ;;  %v582_v40 = vmax.f32 %v537_v8, %v552_v31  ;;  %v556_v48 = vrot.slane %v1669_v44, 3  ;;  %v494_v49 = vmax.f32 %v1643_v20, %v463_v30 }
  0xe1   :  { %v1692_v50 = vmax.f32 %v226_v14, %v250_v41  ;;  %v1694_v51 = vmax.f32 %v225_v29, %v248_v42  ;;  %v467_v6 = vsel %vm459_vm0, %v465_v52, %v466_v53  ;;  %v512_v41 = vsel %vm504_vm1, %v510_v25, %v511_v26 }
  0xe2   :  { %v495_v27 = vmax.f32 %v1671_v45, %v467_v6  ;;  %v555_v42 = vrot.slane %v1671_v45, 3  ;;  %v233_v30 = vmax.f32 %v1703_v59, %v1622_v46  ;;  %v597_v19 = vsel %vm594_vm3, %v595_v13, %v596_v39 }
  0xe3   :  { %329 = vrot.lane.b32.xlu1 %v1692_v50, %s1359_s16  ;;  %327 = vrot.lane.b32.xlu0 %v1694_v51, %s1359_s16  ;;  %v468_v14 = vrot.slane %v1694_v51, 1  ;;  %v619_v32 = vmax.f32 %v582_v40, %v595_v13  ;;  %v539_v33 = vmax.f32 %v494_v49, %v508_v35  ;;  %v558_v34 = vrot.slane %v1694_v51, 3 }
  0xe4   :  { %v254_v2 = vpop.permute.xlu1 %253  ;;  %v252_v16 = vpop.permute.xlu0 %251  ;;  %v540_v55 = vmax.f32 %v495_v27, %v512_v41 }
  0xe5   :  { %v1717_v5 = vmax.f32 %v228_v62, %v254_v2  ;;  %v1719_v21 = vmax.f32 %v227_v17, %v252_v16  ;;  %v497_v56 = vmax.f32 %v1694_v51, %v468_v14  ;;  %v469_v57 = vsel %vm459_vm0, %v466_v53, %v468_v14 }
  0xe6   :  { %v583_v17 = vmax.f32 %v538_v38, %v554_v47  ;;  %v513_v53 = vrot.slane %v1694_v51, 2  ;;  %v598_v2 = vrot.slane %v1669_v44, 4  ;;  %v496_v46 = vmax.f32 %v1669_v44, %v469_v57 }
  0xe7   :  { %333 = vrot.lane.b32.xlu1 %v1717_v5, %s1359_s16  ;;  %331 = vrot.lane.b32.xlu0 %v1719_v21, %s1359_s16  ;;  %v471_v62 = vrot.slane %v1717_v5, 1  ;;  %v470_v63 = vrot.slane %v1719_v21, 1  ;;  %v559_v13 = vsel %vm549_vm2, %v556_v48, %v558_v34  ;;  %v584_v15 = vmax.f32 %v539_v33, %v553_v7 }
  0xe8   :  { %v258_v11 = vpop.permute.xlu1 %257  ;;  %v256_v12 = vpop.permute.xlu0 %255  ;;  %v542_v37 = vmax.f32 %v497_v56, %v513_v53  ;;  %v514_v9 = vsel %vm504_vm1, %v511_v26, %v513_v53  ;;  %v620_v26 = vmax.f32 %v583_v17, %v597_v19  ;;  %v561_v38 = vrot.slane %v1717_v5, 3 }
  0xe9   :  { %v1740_v28 = vmax.f32 %v230_v0, %v258_v11  ;;  %v1742_v29 = vmax.f32 %v229_v36, %v256_v12  ;;  %v557_v0 = vsel %vm549_vm2, %v555_v42, %v556_v48  ;;  %v472_v8 = vsel %vm459_vm0, %v470_v63, %v471_v62 }
  0xea   :  { %v585_v18 = vmax.f32 %v540_v55, %v557_v0  ;;  %v541_v35 = vmax.f32 %v496_v46, %v514_v9  ;;  %v515_v11 = vrot.slane %v1719_v21, 2  ;;  %v599_v12 = vrot.slane %v1694_v51, 4 }
  0xeb   :  { %337 = vrot.lane.b32.xlu1 %v1740_v28, %s1359_s16  ;;  %335 = vrot.lane.b32.xlu0 %v1742_v29, %s1359_s16  ;;  %v473_v58 = vrot.slane %v1742_v29, 1  ;;  %v498_v27 = vmax.f32 %v1719_v21, %v472_v8  ;;  %v587_v31 = vmax.f32 %v542_v37, %v558_v34  ;;  %v563_v40 = vrot.slane %v1742_v29, 3 }
  0xec   :  { %v262_v52 = vpop.permute.xlu1 %261  ;;  %v260_v54 = vpop.permute.xlu0 %259  ;;  %v622_v14 = vmax.f32 %v585_v18, %v598_v2  ;;  %v586_v48 = vmax.f32 %v541_v35, %v559_v13  ;;  %v560_v7 = vrot.slane %v1719_v21, 3  ;;  %v601_v63 = vrot.slane %v1717_v5, 4 }
  0xed   :  { %v1761_v60 = vmax.f32 %v232_v10, %v262_v52  ;;  %v1763_v61 = vmax.f32 %v231_v24, %v260_v54  ;;  %v474_v6 = vsel %vm459_vm0, %v471_v62, %v473_v58  ;;  %v518_v10 = vrot.slane %v1742_v29, 2 }
  0xee   :  { %v499_v25 = vmax.f32 %v1717_v5, %v474_v6  ;;  %v600_v54 = vsel %vm594_vm3, %v598_v2, %v599_v12  ;;  %v621_v62 = vmax.f32 %v584_v15, %v596_v39  ;;  %v500_v17 = vmax.f32 %v1742_v29, %v473_v58 }
  0xef   :  { %341 = vrot.lane.b32.xlu1 %v1761_v60, %s1359_s16  ;;  %339 = vrot.lane.b32.xlu0 %v1763_v61, %s1359_s16  ;;  %v475_v23 = vrot.slane %v1763_v61, 1  ;;  %v476_v24 = vrot.slane %v1761_v60, 1  ;;  %v520_v56 = vrot.slane %v1763_v61, 2  ;;  %v521_v57 = vrot.slane %v1761_v60, 2 }
  0xf0   :  { %v266_v59 = vpop.permute.xlu1 %265  ;;  %v264_v16 = vpop.permute.xlu0 %263  ;;  %v624_v19 = vmax.f32 %v587_v31, %v599_v12  ;;  %v564_v53 = vsel %vm549_vm2, %v561_v38, %v563_v40  ;;  %v623_v2 = vmax.f32 %v586_v48, %v600_v54  ;;  %v562_v39 = vsel %vm549_vm2, %v560_v7, %v561_v38 }
  0xf1   :  { %v1782_v22 = vmax.f32 %v234_v43, %v266_v59  ;;  %v1784_v36 = vmax.f32 %v233_v30, %v264_v16  ;;  %v516_v43 = vrot.slane %v1717_v5, 2  ;;  %v477_v41 = vsel %vm459_vm0, %v475_v23, %v476_v24 }
  0xf2   :  { %v501_v30 = vmax.f32 %v1763_v61, %v477_v41  ;;  %v565_v59 = vrot.slane %v1763_v61, 3  ;;  %v522_v58 = vsel %vm504_vm1, %v520_v56, %v521_v57  ;;  %v566_v18 = vrot.slane %v1761_v60, 3 }
  0xf3   :  { %345 = vrot.lane.b32.xlu1 %v1782_v22, %s1359_s16  ;;  %343 = vrot.lane.b32.xlu0 %v1784_v36, %s1359_s16  ;;  %v519_v47 = vsel %vm504_vm1, %v516_v43, %v518_v10  ;;  %v478_v42 = vrot.slane %v1784_v36, 1  ;;  %v517_v52 = vsel %vm504_vm1, %v515_v11, %v516_v43  ;;  %v523_v33 = vrot.slane %v1784_v36, 2 }
  0xf4   :  { %v544_v49 = vmax.f32 %v499_v25, %v519_v47  ;;  %v543_v55 = vmax.f32 %v498_v27, %v517_v52  ;;  %v546_v34 = vmax.f32 %v501_v30, %v522_v58  ;;  %v545_v6 = vmax.f32 %v500_v17, %v518_v10 }
  0xf5   :  { %v479_v0 = vsel %vm459_vm0, %v476_v24, %v478_v42  ;;  %v503_v37 = vmax.f32 %v1784_v36, %v478_v42  ;;  %v567_v35 = vsel %vm549_vm2, %v565_v59, %v566_v18  ;;  %v568_v25 = vrot.slane %v1784_v36, 3 }
  0xf6   :  { %v589_v46 = vmax.f32 %v544_v49, %v564_v53  ;;  %v588_v16 = vmax.f32 %v543_v55, %v562_v39  ;;  %v502_v8 = vmax.f32 %v1761_v60, %v479_v0  ;;  %v524_v43 = vsel %vm504_vm1, %v521_v57, %v523_v33 }
  0xf7   :  { %645 = vrot.lane.b32.xlu1 %v620_v26, %s1359_s16  ;;  %643 = vrot.lane.b32.xlu0 %v619_v32, %s1359_s16  ;;  %v602_v32 = vrot.slane %v1742_v29, 4  ;;  %v591_v11 = vmax.f32 %v546_v34, %v567_v35  ;;  %v590_v10 = vmax.f32 %v545_v6, %v563_v40  ;;  %v548_v26 = vmax.f32 %v503_v37, %v523_v33 }
  0xf8   :  { %v625_v24 = vmax.f32 %v588_v16, %v601_v63  ;;  %v547_v12 = vmax.f32 %v502_v8, %v524_v43  ;;  %v604_v13 = vrot.slane %v1761_v60, 4  ;;  %v605_v27 = vrot.slane %v1784_v36, 4 }
  0xf9   :  { %v603_v9 = vsel %vm594_vm3, %v601_v63, %v602_v32  ;;  %v627_v31 = vmax.f32 %v590_v10, %v602_v32  ;;  %v593_v38 = vmax.f32 %v548_v26, %v568_v25 }
  0xfa   :  { %v626_v23 = vmax.f32 %v589_v46, %v603_v9  ;;  %v628_v15 = vmax.f32 %v591_v11, %v604_v13  ;;  %v606_v40 = vsel %vm594_vm3, %v604_v13, %v605_v27 }
  0xfb   :  { %649 = vrot.lane.b32.xlu1 %v622_v14, %s1359_s16  ;;  %647 = vrot.lane.b32.xlu0 %v621_v62, %s1359_s16  ;;  %v569_v14 = vsel %vm549_vm2, %v566_v18, %v568_v25  ;;  %v630_v41 = vmax.f32 %v593_v38, %v605_v27 }
  0xfc   :  { %v592_v47 = vmax.f32 %v547_v12, %v569_v14 }
  0xfe   :  { %v629_v42 = vmax.f32 %v592_v47, %v606_v40 }
  0xff   :  { %653 = vrot.lane.b32.xlu1 %v624_v19, %s1359_s16  ;;  %651 = vrot.lane.b32.xlu0 %v623_v2, %s1359_s16 }
 0x103   :  { %657 = vrot.lane.b32.xlu1 %v626_v23, %s1359_s16  ;;  %655 = vrot.lane.b32.xlu0 %v625_v24, %s1359_s16 }
 0x107   :  { %661 = vrot.lane.b32.xlu1 %v628_v15, %s1359_s16  ;;  %659 = vrot.lane.b32.xlu0 %v627_v31, %s1359_s16 }
 0x10b   :  { %665 = vrot.lane.b32.xlu1 %v630_v41, %s1359_s16  ;;  %663 = vrot.lane.b32.xlu0 %v629_v42, %s1359_s16 }
 0x149   :  { %v318_v48 = vpop.permute.xlu1 %317  ;;  %v316_v49 = vpop.permute.xlu0 %315 }
 0x14a   :  { %v1849_v52 = vmax.f32 %v1627_v1, %v318_v48  ;;  %v1852_v7 = vmax.f32 %v1629_v3, %v316_v49 }
 0x14c   :  { %397 = vrot.lane.b32.xlu1 %v1849_v52, %s1359_s16  ;;  %395 = vrot.lane.b32.xlu0 %v1852_v7, %s1359_s16  ;;  %v695_v54 = vrot.slane %v1849_v52, 1  ;;  %v739_v55 = vrot.slane %v1849_v52, 2  ;;  %v783_v56 = vrot.slane %v1849_v52, 3  ;;  %v835_v57 = vrot.slane %v1849_v52, 4 }
 0x14d   :  { %v322_v62 = vpop.permute.xlu1 %321  ;;  %v320_v1 = vpop.permute.xlu0 %319  ;;  %v694_v63 = vrot.slane %v1852_v7, 1  ;;  %v738_v3 = vrot.slane %v1852_v7, 2  ;;  %v782_v30 = vrot.slane %v1852_v7, 3  ;;  %v834_v17 = vrot.slane %v1852_v7, 4 }
 0x14e   :  { %v1867_v19 = vmax.f32 %v1641_v4, %v322_v62  ;;  %v1870_v53 = vmax.f32 %v1643_v20, %v320_v1 }
 0x14f   :  { %v1873_v32 = vsel %vm459_vm0, %v694_v63, %v695_v54  ;;  %v1876_v0 = vsel %vm504_vm1, %v738_v3, %v739_v55  ;;  %v1889_v18 = vsel %vm549_vm2, %v782_v30, %v783_v56  ;;  %v1892_v33 = vsel %vm594_vm3, %v834_v17, %v835_v57 }
 0x150   :  { %v787_v2 = vrot.slane %v1867_v19, 3  ;;  %v839_v46 = vrot.slane %v1867_v19, 4  ;;  %401 = vrot.lane.b32.xlu1 %v1867_v19, %s1359_s16  ;;  %399 = vrot.lane.b32.xlu0 %v1870_v53, %s1359_s16  ;;  %v697_v4 = vrot.slane %v1870_v53, 1  ;;  %v741_v20 = vrot.slane %v1870_v53, 2 }
 0x151   :  { %v326_v39 = vpop.permute.xlu1 %325  ;;  %v324_v59 = vpop.permute.xlu0 %323  ;;  %v785_v16 = vrot.slane %v1870_v53, 3  ;;  %v837_v58 = vrot.slane %v1870_v53, 4  ;;  %v726_v35 = vmax.f32 %v1852_v7, %v1873_v32 }
 0x152   :  { %v1895_v34 = vmax.f32 %v1669_v44, %v326_v39  ;;  %v1898_v6 = vmax.f32 %v1671_v45, %v324_v59  ;;  %v728_v37 = vmax.f32 %v1870_v53, %v697_v4  ;;  %v698_v8 = vsel %vm459_vm0, %v695_v54, %v697_v4 }
 0x153   :  { %v788_v9 = vsel %vm549_vm2, %v785_v16, %v787_v2  ;;  %v840_v23 = vsel %vm594_vm3, %v837_v58, %v839_v46  ;;  %v727_v24 = vmax.f32 %v1849_v52, %v698_v8  ;;  %v742_v45 = vsel %vm504_vm1, %v739_v55, %v741_v20 }
 0x154   :  { %405 = vrot.lane.b32.xlu1 %v1895_v34, %s1359_s16  ;;  %403 = vrot.lane.b32.xlu0 %v1898_v6, %s1359_s16  ;;  %v772_v44 = vmax.f32 %v728_v37, %v741_v20  ;;  %v786_v25 = vsel %vm549_vm2, %v783_v56, %v785_v16  ;;  %v699_v43 = vrot.slane %v1898_v6, 1  ;;  %v700_v12 = vrot.slane %v1895_v34, 1 }
 0x155   :  { %v330_v11 = vpop.permute.xlu1 %329  ;;  %v328_v10 = vpop.permute.xlu0 %327  ;;  %v771_v26 = vmax.f32 %v727_v24, %v742_v45  ;;  %v743_v13 = vrot.slane %v1898_v6, 2  ;;  %v744_v27 = vrot.slane %v1895_v34, 2  ;;  %v838_v38 = vsel %vm594_vm3, %v835_v57, %v837_v58 }
 0x156   :  { %v1918_v14 = vmax.f32 %v1692_v50, %v330_v11  ;;  %v1921_v15 = vmax.f32 %v1694_v51, %v328_v10  ;;  %v824_v31 = vmax.f32 %v772_v44, %v788_v9  ;;  %v701_v40 = vsel %vm459_vm0, %v699_v43, %v700_v12 }
 0x157   :  { %v823_v47 = vmax.f32 %v771_v26, %v786_v25  ;;  %v745_v41 = vsel %vm504_vm1, %v743_v13, %v744_v27  ;;  %v789_v42 = vrot.slane %v1898_v6, 3  ;;  %v790_v20 = vrot.slane %v1895_v34, 3 }
 0x158   :  { %v794_v48 = vrot.slane %v1918_v14, 3  ;;  %v846_v49 = vrot.slane %v1918_v14, 4  ;;  %409 = vrot.lane.b32.xlu1 %v1918_v14, %s1359_s16  ;;  %407 = vrot.lane.b32.xlu0 %v1921_v15, %s1359_s16  ;;  %v702_v50 = vrot.slane %v1921_v15, 1  ;;  %v746_v51 = vrot.slane %v1921_v15, 2 }
 0x159   :  { %v334_v54 = vpop.permute.xlu1 %333  ;;  %v332_v55 = vpop.permute.xlu0 %331  ;;  %v792_v56 = vrot.slane %v1921_v15, 3  ;;  %v844_v57 = vrot.slane %v1921_v15, 4  ;;  %v876_v62 = vmax.f32 %v824_v31, %v840_v23  ;;  %v1937_v1 = vmax.f32 %v823_v47, %v838_v38 }
 0x15a   :  { %v1940_v63 = vmax.f32 %v1717_v5, %v334_v54  ;;  %v1943_v3 = vmax.f32 %v1719_v21, %v332_v55  ;;  %v731_v30 = vmax.f32 %v1921_v15, %v702_v50  ;;  %v703_v17 = vsel %vm459_vm0, %v700_v12, %v702_v50 }
 0x15b   :  { %v795_v2 = vsel %vm549_vm2, %v792_v56, %v794_v48  ;;  %v901_v46 = vrot.slane %v876_v62, 4  ;;  %v899_v4 = vrot.slane %v1937_v1, 4  ;;  %v729_v21 = vmax.f32 %v1898_v6, %v701_v40 }
 0x15c   :  { %413 = vrot.lane.b32.xlu1 %v1940_v63, %s1359_s16  ;;  %411 = vrot.lane.b32.xlu0 %v1943_v3, %s1359_s16  ;;  %v775_v5 = vmax.f32 %v731_v30, %v746_v51  ;;  %v730_v39 = vmax.f32 %v1895_v34, %v703_v17  ;;  %v847_v58 = vsel %vm594_vm3, %v844_v57, %v846_v49  ;;  %v841_v9 = vrot.slane %v1898_v6, 4 }
 0x15d   :  { %v338_v59 = vpop.permute.xlu1 %337  ;;  %v336_v16 = vpop.permute.xlu0 %335  ;;  %v1957_v37 = vmax.f32 %v876_v62, %v901_v46  ;;  %v1962_v8 = vsel %vm594_vm3, %v899_v4, %v901_v46  ;;  %v747_v45 = vsel %vm504_vm1, %v744_v27, %v746_v51  ;;  %v773_v25 = vmax.f32 %v729_v21, %v745_v41 }
 0x15e   :  { %v1966_v23 = vmax.f32 %v1740_v28, %v338_v59  ;;  %v1969_v24 = vmax.f32 %v1742_v29, %v336_v16  ;;  %v827_v44 = vmax.f32 %v775_v5, %v795_v2  ;;  %v774_v43 = vmax.f32 %v730_v39, %v747_v45 }
 0x15f   :  { %v791_v11 = vsel %vm549_vm2, %v789_v42, %v790_v20  ;;  %v842_v10 = vrot.slane %v1895_v34, 4  ;;  %v793_v47 = vsel %vm549_vm2, %v790_v20, %v792_v56  ;;  %v705_v62 = vrot.slane %v1940_v63, 1 }
 0x160   :  { %v801_v26 = vrot.slane %v1966_v23, 3  ;;  %v853_v12 = vrot.slane %v1966_v23, 4  ;;  %417 = vrot.lane.b32.xlu1 %v1966_v23, %s1359_s16  ;;  %415 = vrot.lane.b32.xlu0 %v1969_v24, %s1359_s16  ;;  %v879_v28 = vmax.f32 %v827_v44, %v847_v58  ;;  %v707_v29 = vrot.slane %v1969_v24, 1 }
 0x161   :  { %v342_v13 = vpop.permute.xlu1 %341  ;;  %v340_v27 = vpop.permute.xlu0 %339  ;;  %v799_v31 = vrot.slane %v1969_v24, 3  ;;  %v851_v38 = vrot.slane %v1969_v24, 4  ;;  %v825_v40 = vmax.f32 %v773_v25, %v791_v11  ;;  %v751_v49 = vrot.slane %v1969_v24, 2 }
 0x162   :  { %v1985_v41 = vmax.f32 %v1761_v60, %v342_v13  ;;  %v1988_v42 = vmax.f32 %v1763_v61, %v340_v27  ;;  %v734_v48 = vmax.f32 %v1969_v24, %v707_v29  ;;  %v906_v50 = vrot.slane %v879_v28, 4 }
 0x163   :  { %v802_v51 = vsel %vm549_vm2, %v799_v31, %v801_v26  ;;  %v854_v54 = vsel %vm594_vm3, %v851_v38, %v853_v12  ;;  %v826_v55 = vmax.f32 %v774_v43, %v793_v47  ;;  %v843_v61 = vsel %vm594_vm3, %v841_v9, %v842_v10 }
 0x164   :  { %421 = vrot.lane.b32.xlu1 %v1985_v41, %s1359_s16  ;;  %419 = vrot.lane.b32.xlu0 %v1988_v42, %s1359_s16  ;;  %v778_v60 = vmax.f32 %v734_v48, %v751_v49  ;;  %v845_v56 = vsel %vm594_vm3, %v842_v10, %v844_v57  ;;  %v2003_v2 = vmax.f32 %v825_v40, %v843_v61  ;;  %v749_v5 = vrot.slane %v1940_v63, 2 }
 0x165   :  { %v346_v30 = vpop.permute.xlu1 %345  ;;  %v344_v17 = vpop.permute.xlu0 %343  ;;  %v2005_v46 = vmax.f32 %v826_v55, %v845_v56  ;;  %v770_v20 = vmax.f32 %v726_v35, %v1876_v0  ;;  %v708_v59 = vsel %vm459_vm0, %v705_v62, %v707_v29  ;;  %v797_v11 = vrot.slane %v1940_v63, 3 }
 0x166   :  { %v2013_v21 = vmax.f32 %v1782_v22, %v346_v30  ;;  %v2016_v57 = vmax.f32 %v1784_v36, %v344_v17  ;;  %v830_v39 = vmax.f32 %v778_v60, %v802_v51  ;;  %v903_v16 = vrot.slane %v2003_v2, 4 }
 0x167   :  { %v904_v58 = vrot.slane %v2005_v46, 4  ;;  %v822_v9 = vmax.f32 %v770_v20, %v1889_v18  ;;  %v733_v32 = vmax.f32 %v1940_v63, %v708_v59  ;;  %v935_v22 = vmax.f32 %v879_v28, %v906_v50 }
 0x168   :  { %v808_v0 = vrot.slane %v2013_v21, 3  ;;  %425 = vrot.lane.b32.xlu1 %v2013_v21, %s1359_s16  ;;  %423 = vrot.lane.b32.xlu0 %v2016_v57, %s1359_s16  ;;  %v931_v36 = vmax.f32 %v1937_v1, %v1962_v8  ;;  %v882_v35 = vmax.f32 %v830_v39, %v854_v54  ;;  %v752_v43 = vsel %vm504_vm1, %v749_v5, %v751_v49 }
 0x169   :  { %v646_v44 = vpop.permute.xlu1 %645  ;;  %v644_v45 = vpop.permute.xlu0 %643  ;;  %v905_v25 = vsel %vm594_vm3, %v903_v16, %v904_v58  ;;  %v874_v18 = vmax.f32 %v822_v9, %v1892_v33  ;;  %v712_v10 = vrot.slane %v2016_v57, 1  ;;  %v777_v26 = vmax.f32 %v733_v32, %v752_v43 }
 0x16a   :  { %682 = vst.msk [vmem:[%s2386_s1 + $0x4] sm:$0xff] %vm681_vm4, %v646_v44  ;;  %v911_v8 = vrot.slane %v882_v35, 4  ;;  %v849_v33 = vrot.slane %v1940_v63, 4  ;;  %v800_v28 = vsel %vm549_vm2, %v797_v11, %v799_v31  ;;  %v2046_v29 = vsel %vm594_vm3, %v904_v58, %v906_v50 }
 0x16b   :  { %680 = vst.msk [vmem:[%s2386_s1 - $0x4] sm:$0xf0] %vm679_vm5, %v644_v45  ;;  %v898_v12 = vrot.slane %v874_v18, 4  ;;  %v704_v13 = vrot.slane %v1943_v3, 1  ;;  %v933_v47 = vmax.f32 %v2003_v2, %v905_v25  ;;  %v829_v40 = vmax.f32 %v777_v26, %v800_v28 }
 0x16c   :  { %964 = vrot.lane.b32.xlu1 %v935_v22, %s1357_s19  ;;  %958 = vrot.lane.b32.xlu0 %v1957_v37, %s1357_s19  ;;  %v938_v27 = vmax.f32 %v882_v35, %v911_v8  ;;  %v748_v48 = vrot.slane %v1943_v3, 2  ;;  %v852_v50 = vsel %vm594_vm3, %v849_v33, %v851_v38  ;;  %v796_v37 = vrot.slane %v1943_v3, 3 }
 0x16d   :  { %v650_v49 = vpop.permute.xlu1 %649  ;;  %v648_v51 = vpop.permute.xlu0 %647  ;;  %v900_v31 = vsel %vm594_vm3, %v898_v12, %v899_v4  ;;  %v706_v54 = vsel %vm459_vm0, %v704_v13, %v705_v62  ;;  %v881_v4 = vmax.f32 %v829_v40, %v852_v50  ;;  %v934_v55 = vmax.f32 %v2005_v46, %v2046_v29 }
 0x16e   :  { %685 = vst.msk [vmem:[%s2386_s1 + $0xc] sm:$0xf0] %vm679_vm5, %v650_v49  ;;  %v930_v1 = vmax.f32 %v874_v18, %v900_v31  ;;  %v732_v38 = vmax.f32 %v1943_v3, %v706_v54  ;;  %v750_v60 = vsel %vm504_vm1, %v748_v48, %v749_v5  ;;  %v848_v61 = vrot.slane %v1943_v3, 4 }
 0x16f   :  { %684 = vst.msk [vmem:[%s2386_s1 + $0xc] sm:$0xf] %vm683_vm6, %v648_v51  ;;  %v709_v56 = vrot.slane %v1988_v42, 1  ;;  %v710_v62 = vrot.slane %v1985_v41, 1  ;;  %v909_v30 = vrot.slane %v881_v4, 4  ;;  %v753_v2 = vrot.slane %v1988_v42, 2 }
 0x170   :  { %956 = vrot.lane.b32.xlu1 %v931_v36, %s1357_s19  ;;  %970 = vrot.lane.b32.xlu0 %v938_v27, %s1357_s19  ;;  %v776_v17 = vmax.f32 %v732_v38, %v750_v60  ;;  %v754_v46 = vrot.slane %v1985_v41, 2  ;;  %v798_v5 = vsel %vm549_vm2, %v796_v37, %v797_v11  ;;  %v756_v58 = vrot.slane %v2016_v57, 2 }
 0x171   :  { %v654_v20 = vpop.permute.xlu1 %653  ;;  %v652_v39 = vpop.permute.xlu0 %651  ;;  %v711_v59 = vsel %vm459_vm0, %v709_v56, %v710_v62  ;;  %v713_v16 = vsel %vm459_vm0, %v710_v62, %v712_v10  ;;  %v850_v32 = vsel %vm594_vm3, %v848_v61, %v849_v33  ;;  %v912_v35 = vsel %vm594_vm3, %v909_v30, %v911_v8 }
 0x172   :  { %687 = vst.msk [vmem:[%s2386_s1 + $0x1c] sm:$0xf] %vm683_vm6, %v654_v20  ;;  %v828_v9 = vmax.f32 %v776_v17, %v798_v5  ;;  %v735_v22 = vmax.f32 %v1988_v42, %v711_v59  ;;  %v736_v36 = vmax.f32 %v1985_v41, %v713_v16  ;;  %v755_v44 = vsel %vm504_vm1, %v753_v2, %v754_v46 }
 0x173   :  { %686 = vst.msk [vmem:[%s2386_s1 + $0x14] sm:$0xff] %vm681_vm4, %v652_v39  ;;  %v757_v45 = vsel %vm504_vm1, %v754_v46, %v756_v58  ;;  %v803_v25 = vrot.slane %v1988_v42, 3  ;;  %v804_v26 = vrot.slane %v1985_v41, 3  ;;  %v806_v28 = vrot.slane %v2016_v57, 3 }
 0x174   :  { %960 = vrot.lane.b32.xlu1 %v933_v47, %s1357_s19  ;;  %954 = vrot.lane.b32.xlu0 %v930_v1, %s1357_s19  ;;  %v880_v18 = vmax.f32 %v828_v9, %v850_v32  ;;  %v779_v43 = vmax.f32 %v735_v22, %v755_v44  ;;  %v780_v11 = vmax.f32 %v736_v36, %v757_v45  ;;  %v855_v8 = vrot.slane %v1988_v42, 4 }
 0x175   :  { %v658_v33 = vpop.permute.xlu1 %657  ;;  %v656_v12 = vpop.permute.xlu0 %655  ;;  %v856_v29 = vrot.slane %v1985_v41, 4  ;;  %v858_v13 = vrot.slane %v2016_v57, 4  ;;  %v937_v27 = vmax.f32 %v881_v4, %v912_v35  ;;  %v805_v40 = vsel %vm549_vm2, %v803_v25, %v804_v26 }
 0x176   :  { %689 = vst.msk [vmem:[%s2386_s1 + $0x24] sm:$0xff] %vm681_vm4, %v658_v33  ;;  %v908_v47 = vrot.slane %v880_v18, 4  ;;  %v737_v48 = vmax.f32 %v2016_v57, %v712_v10  ;;  %v860_v49 = vrot.slane %v2013_v21, 4  ;;  %v807_v51 = vsel %vm549_vm2, %v804_v26, %v806_v28 }
 0x177   :  { %688 = vst.msk [vmem:[%s2386_s1 + $0x1c] sm:$0xf0] %vm679_vm5, %v656_v12  ;;  %v831_v31 = vmax.f32 %v779_v43, %v805_v40  ;;  %v857_v50 = vsel %vm594_vm3, %v855_v8, %v856_v29  ;;  %v832_v37 = vmax.f32 %v780_v11, %v807_v51  ;;  %v859_v60 = vsel %vm594_vm3, %v856_v29, %v858_v13 }
 0x178   :  { %968 = vrot.lane.b32.xlu1 %v937_v27, %s1357_s19  ;;  %962 = vrot.lane.b32.xlu0 %v934_v55, %s1357_s19  ;;  %v910_v54 = vsel %vm594_vm3, %v908_v47, %v909_v30  ;;  %v781_v1 = vmax.f32 %v737_v48, %v756_v58  ;;  %v809_v61 = vsel %vm549_vm2, %v806_v28, %v808_v0 }
 0x179   :  { %v662_v4 = vpop.permute.xlu1 %661  ;;  %v660_v38 = vpop.permute.xlu0 %659  ;;  %v883_v10 = vmax.f32 %v831_v31, %v857_v50  ;;  %v936_v55 = vmax.f32 %v880_v18, %v910_v54  ;;  %v884_v56 = vmax.f32 %v832_v37, %v859_v60  ;;  %v861_v30 = vsel %vm594_vm3, %v858_v13, %v860_v49 }
 0x17a   :  { %691 = vst.msk [vmem:[%s2386_s1 + $0x2c] sm:$0xf0] %vm679_vm5, %v662_v4  ;;  %v833_v62 = vmax.f32 %v781_v1, %v809_v61 }
 0x17b   :  { %690 = vst.msk [vmem:[%s2386_s1 + $0x2c] sm:$0xf] %vm683_vm6, %v660_v38  ;;  %v913_v17 = vrot.slane %v883_v10, 4  ;;  %v914_v2 = vrot.slane %v884_v56, 4 }
 0x17c   :  { %966 = vrot.lane.b32.xlu0 %v936_v55, %s1357_s19  ;;  %v885_v0 = vmax.f32 %v833_v62, %v861_v30 }
 0x17d   :  { %v666_v46 = vpop.permute.xlu1 %665  ;;  %v664_v20 = vpop.permute.xlu0 %663  ;;  %v915_v39 = vsel %vm594_vm3, %v913_v17, %v914_v2 }
 0x17e   :  { %693 = vst.msk [vmem:[%s2386_s1 + $0x3c] sm:$0xf] %vm683_vm6, %v666_v46  ;;  %v916_v5 = vrot.slane %v885_v0, 4  ;;  %v939_v59 = vmax.f32 %v883_v10, %v915_v39 }
 0x17f   :  { %692 = vst.msk [vmem:[%s2386_s1 + $0x34] sm:$0xff] %vm681_vm4, %v664_v20 }
 0x180   :  { %v917_v16 = vsel %vm594_vm3, %v914_v2, %v916_v5  ;;  %972 = vrot.lane.b32.xlu1 %v939_v59, %s1357_s19  ;;  %v941_v9 = vmax.f32 %v885_v0, %v916_v5 }
 0x181   :  { %v940_v58 = vmax.f32 %v884_v56, %v917_v16 }
 0x183   :  { %974 = vrot.lane.b32.xlu0 %v940_v58, %s1357_s19 }
 0x184   :  { %976 = vrot.lane.b32.xlu1 %v941_v9, %s1357_s19 }
 0x1be   :  { %v398_v32 = vpop.permute.xlu1 %397  ;;  %v396_v22 = vpop.permute.xlu0 %395 }
 0x1bf   :  { %v444_v36 = vmax.f32 %v1849_v52, %v398_v32  ;;  %v443_v35 = vmax.f32 %v1852_v7, %v396_v22 }
 0x1c1   :  { %v1021_v44 = vrot.slane %v444_v36, 1  ;;  %v1073_v45 = vrot.slane %v444_v36, 2  ;;  %v1125_v25 = vrot.slane %v444_v36, 3  ;;  %v1020_v18 = vrot.slane %v443_v35, 1 }
 0x1c2   :  { %v1072_v43 = vrot.slane %v443_v35, 2  ;;  %v1124_v11 = vrot.slane %v443_v35, 3  ;;  %v402_v26 = vpop.permute.xlu1 %401  ;;  %v400_v33 = vpop.permute.xlu0 %399  ;;  %v1177_v12 = vrot.slane %v444_v36, 4  ;;  %v1176_v28 = vrot.slane %v443_v35, 4 }
 0x1c3   :  { %v446_v8 = vmax.f32 %v1867_v19, %v402_v26  ;;  %v445_v29 = vmax.f32 %v1870_v53, %v400_v33  ;;  %v1022_v13 = vsel %vm459_vm0, %v1020_v18, %v1021_v44 }
 0x1c4   :  { %v1074_v52 = vsel %vm504_vm1, %v1072_v43, %v1073_v45  ;;  %v1060_v27 = vmax.f32 %v443_v35, %v1022_v13  ;;  %v1126_v7 = vsel %vm549_vm2, %v1124_v11, %v1125_v25  ;;  %v1178_v19 = vsel %vm594_vm3, %v1176_v28, %v1177_v12 }
 0x1c5   :  { %v1025_v47 = vrot.slane %v446_v8, 1  ;;  %v1077_v40 = vrot.slane %v446_v8, 2  ;;  %v1129_v48 = vrot.slane %v446_v8, 3  ;;  %v1023_v49 = vrot.slane %v445_v29, 1 }
 0x1c6   :  { %v1075_v51 = vrot.slane %v445_v29, 2  ;;  %v1127_v31 = vrot.slane %v445_v29, 3  ;;  %v406_v50 = vpop.permute.xlu1 %405  ;;  %v404_v54 = vpop.permute.xlu0 %403  ;;  %v1112_v37 = vmax.f32 %v1060_v27, %v1074_v52  ;;  %v1181_v1 = vrot.slane %v446_v8, 4 }
 0x1c7   :  { %v2163_v53 = vmax.f32 %v1895_v34, %v406_v50  ;;  %v1024_v4 = vsel %vm459_vm0, %v1021_v44, %v1023_v49  ;;  %v1026_v38 = vsel %vm459_vm0, %v1023_v49, %v1025_v47  ;;  %v1179_v60 = vrot.slane %v445_v29, 4 }
 0x1c8   :  { %v447_v10 = vmax.f32 %v1898_v6, %v404_v54  ;;  %v1164_v61 = vmax.f32 %v1112_v37, %v1126_v7  ;;  %v1061_v55 = vmax.f32 %v444_v36, %v1024_v4  ;;  %v1062_v56 = vmax.f32 %v445_v29, %v1026_v38 }
 0x1c9   :  { %v1076_v62 = vsel %vm504_vm1, %v1073_v45, %v1075_v51  ;;  %v1078_v30 = vsel %vm504_vm1, %v1075_v51, %v1077_v40  ;;  %v1128_v17 = vsel %vm549_vm2, %v1125_v25, %v1127_v31  ;;  %v1130_v2 = vsel %vm549_vm2, %v1127_v31, %v1129_v48 }
 0x1ca   :  { %v1028_v34 = vrot.slane %v2163_v53, 1  ;;  %v410_v0 = vpop.permute.xlu1 %409  ;;  %v408_v46 = vpop.permute.xlu0 %407  ;;  %v1216_v20 = vmax.f32 %v1164_v61, %v1178_v19  ;;  %v1113_v39 = vmax.f32 %v1061_v55, %v1076_v62  ;;  %v1114_v5 = vmax.f32 %v1062_v56, %v1078_v30 }
 0x1cb   :  { %v1080_v6 = vrot.slane %v2163_v53, 2  ;;  %v1132_v59 = vrot.slane %v2163_v53, 3  ;;  %v1184_v16 = vrot.slane %v2163_v53, 4  ;;  %v1027_v58 = vrot.slane %v447_v10, 1 }
 0x1cc   :  { %v1079_v9 = vrot.slane %v447_v10, 2  ;;  %v1165_v32 = vmax.f32 %v1113_v39, %v1128_v17  ;;  %v1166_v22 = vmax.f32 %v1114_v5, %v1130_v2  ;;  %v1180_v36 = vsel %vm594_vm3, %v1177_v12, %v1179_v60 }
 0x1cd   :  { %v1131_v35 = vrot.slane %v447_v10, 3  ;;  %v1182_v44 = vsel %vm594_vm3, %v1179_v60, %v1181_v1  ;;  %v1029_v45 = vsel %vm459_vm0, %v1027_v58, %v1028_v34  ;;  %v1183_v25 = vrot.slane %v447_v10, 4 }
 0x1ce   :  { %v450_v18 = vmax.f32 %v1918_v14, %v410_v0  ;;  %v414_v43 = vpop.permute.xlu1 %413  ;;  %v412_v11 = vpop.permute.xlu0 %411  ;;  %v1240_v26 = vrot.slane %v1216_v20, 4  ;;  %v1217_v33 = vmax.f32 %v1165_v32, %v1180_v36  ;;  %v1218_v28 = vmax.f32 %v1166_v22, %v1182_v44 }
 0x1cf   :  { %v1063_v8 = vmax.f32 %v447_v10, %v1029_v45  ;;  %v1081_v29 = vsel %vm504_vm1, %v1079_v9, %v1080_v6  ;;  %v1133_v13 = vsel %vm549_vm2, %v1131_v35, %v1132_v59  ;;  %v1185_v12 = vsel %vm594_vm3, %v1183_v25, %v1184_v16 }
 0x1d0   :  { %v1032_v52 = vrot.slane %v450_v18, 1  ;;  %v1241_v27 = vrot.slane %v1217_v33, 4  ;;  %v1243_v7 = vrot.slane %v1218_v28, 4  ;;  %v1084_v40 = vrot.slane %v450_v18, 2 }
 0x1d1   :  { %v1115_v47 = vmax.f32 %v1063_v8, %v1081_v29  ;;  %v1136_v14 = vrot.slane %v450_v18, 3  ;;  %v1188_v48 = vrot.slane %v450_v18, 4  ;;  %v449_v49 = vmax.f32 %v1921_v15, %v408_v46 }
 0x1d2   :  { %v2187_v51 = vmax.f32 %v1940_v63, %v414_v43  ;;  %v418_v31 = vpop.permute.xlu1 %417  ;;  %v416_v50 = vpop.permute.xlu0 %415  ;;  %v1242_v54 = vsel %vm594_vm3, %v1240_v26, %v1241_v27  ;;  %v1244_v37 = vsel %vm594_vm3, %v1241_v27, %v1243_v7  ;;  %v1274_v19 = vmax.f32 %v1218_v28, %v1243_v7 }
 0x1d3   :  { %v1167_v1 = vmax.f32 %v1115_v47, %v1133_v13  ;;  %v1272_v4 = vmax.f32 %v1216_v20, %v1242_v54  ;;  %v1273_v38 = vmax.f32 %v1217_v33, %v1244_v37  ;;  %v1030_v60 = vrot.slane %v449_v49, 1 }
 0x1d4   :  { %v1082_v10 = vrot.slane %v449_v49, 2  ;;  %v1299_v61 = vrot.slane %v1274_v19, 4  ;;  %v1134_v55 = vrot.slane %v449_v49, 3  ;;  %v1186_v56 = vrot.slane %v449_v49, 4 }
 0x1d5   :  { %v451_v15 = vmax.f32 %v1943_v3, %v412_v11  ;;  %v1296_v63 = vrot.slane %v1272_v4, 4  ;;  %v1297_v62 = vrot.slane %v1273_v38, 4  ;;  %v1031_v30 = vsel %vm459_vm0, %v1028_v34, %v1030_v60 }
 0x1d6   :  { %v1033_v17 = vsel %vm459_vm0, %v1030_v60, %v1032_v52  ;;  %v2194_v2 = vpop.permute.xlu1 %421  ;;  %v2196_v0 = vpop.permute.xlu0 %419  ;;  %v1219_v46 = vmax.f32 %v1167_v1, %v1185_v12  ;;  %v1064_v20 = vmax.f32 %v2163_v53, %v1031_v30  ;;  %v1083_v5 = vsel %vm504_vm1, %v1080_v6, %v1082_v10 }
 0x1d7   :  { %v1065_v39 = vmax.f32 %v449_v49, %v1033_v17  ;;  %v1298_v58 = vsel %vm594_vm3, %v1296_v63, %v1297_v62  ;;  %v1300_v3 = vsel %vm594_vm3, %v1297_v62, %v1299_v61  ;;  %v1085_v9 = vsel %vm504_vm1, %v1082_v10, %v1084_v40 }
 0x1d8   :  { %v1135_v34 = vsel %vm549_vm2, %v1132_v59, %v1134_v55  ;;  %v1324_v32 = vmax.f32 %v1272_v4, %v1298_v58  ;;  %v1325_v22 = vmax.f32 %v1273_v38, %v1300_v3  ;;  %v1116_v36 = vmax.f32 %v1064_v20, %v1083_v5 }
 0x1d9   :  { %v1117_v35 = vmax.f32 %v1065_v39, %v1085_v9  ;;  %v1137_v44 = vsel %vm549_vm2, %v1134_v55, %v1136_v14  ;;  %v1187_v45 = vsel %vm594_vm3, %v1184_v16, %v1186_v56  ;;  %v1189_v6 = vsel %vm594_vm3, %v1186_v56, %v1188_v48 }
 0x1da   :  { %v1035_v25 = vrot.slane %v2187_v51, 1  ;;  %v2210_v18 = vpop.permute.xlu1 %425  ;;  %v2212_v43 = vpop.permute.xlu0 %423  ;;  %1332 = vst.msk [vmem:[%s2387_s3] sm:$0xff] %vm681_vm4, %v1324_v32  ;;  %1333 = vst.msk [vmem:[%s2387_s3 + $0x8] sm:$0xff] %vm681_vm4, %v1325_v22  ;;  %v1168_v53 = vmax.f32 %v1116_v36, %v1135_v34  ;;  %v1087_v16 = vrot.slane %v2187_v51, 2  ;;  %v1139_v11 = vrot.slane %v2187_v51, 3 }
 0x1db   :  { %v1169_v59 = vmax.f32 %v1117_v35, %v1137_v44  ;;  %v1191_v26 = vrot.slane %v2187_v51, 4  ;;  %v1034_v33 = vrot.slane %v451_v15, 1  ;;  %v1086_v28 = vrot.slane %v451_v15, 2 }
 0x1dc   :  { %v1138_v8 = vrot.slane %v451_v15, 3  ;;  %v1220_v29 = vmax.f32 %v1168_v53, %v1187_v45  ;;  %v1190_v12 = vrot.slane %v451_v15, 4  ;;  %v2226_v52 = vmax.f32 %v1966_v23, %v418_v31 }
 0x1dd   :  { %v1221_v13 = vmax.f32 %v1169_v59, %v1189_v6  ;;  %v1036_v27 = vsel %vm459_vm0, %v1034_v33, %v1035_v25  ;;  %v2230_v7 = vmax.f32 %v1969_v24, %v416_v50  ;;  %v1245_v14 = vrot.slane %v1219_v46, 4 }
 0x1de   :  { %v965_v47 = vpop.permute.xlu1 %964  ;;  %v959_v40 = vpop.permute.xlu0 %958  ;;  %v1246_v48 = vrot.slane %v1220_v29, 4  ;;  %v1066_v54 = vmax.f32 %v451_v15, %v1036_v27  ;;  %v1088_v23 = vsel %vm504_vm1, %v1086_v28, %v1087_v16  ;;  %v1140_v24 = vsel %vm549_vm2, %v1138_v8, %v1139_v11 }
 0x1df   :  { %v1248_v49 = vrot.slane %v1221_v13, 4  ;;  %997 = vst.msk [vmem:[%s2388_s2 + $0x1e] sm:$0x3] %vm993_vm7, %v965_v47  ;;  %994 = vst.msk [vmem:[%s2388_s2 + $0xe] sm:$0x3] %vm993_vm7, %v959_v40  ;;  %v1192_v31 = vsel %vm594_vm3, %v1190_v12, %v1191_v26  ;;  %v1039_v50 = vrot.slane %v2226_v52, 1 }
 0x1e0   :  { %v1247_v37 = vsel %vm594_vm3, %v1245_v14, %v1246_v48  ;;  %v1118_v4 = vmax.f32 %v1066_v54, %v1088_v23  ;;  %v1037_v10 = vrot.slane %v2230_v7, 1  ;;  %v1089_v61 = vrot.slane %v2230_v7, 2 }
 0x1e1   :  { %v1249_v19 = vsel %vm594_vm3, %v1246_v48, %v1248_v49  ;;  %v1277_v1 = vmax.f32 %v1221_v13, %v1248_v49  ;;  %v1275_v38 = vmax.f32 %v1219_v46, %v1247_v37  ;;  %v1091_v62 = vrot.slane %v2226_v52, 2 }
 0x1e2   :  { %v1276_v60 = vmax.f32 %v1220_v29, %v1249_v19  ;;  %v957_v55 = vpop.permute.xlu1 %956  ;;  %v971_v56 = vpop.permute.xlu0 %970  ;;  %v1170_v63 = vmax.f32 %v1118_v4, %v1140_v24  ;;  %v1141_v30 = vrot.slane %v2230_v7, 3  ;;  %v1038_v20 = vsel %vm459_vm0, %v1035_v25, %v1037_v10 }
 0x1e3   :  { %v1304_v15 = vrot.slane %v1277_v1, 4  ;;  %992 = vst.msk [vmem:[%s2388_s2 + $0x6] sm:$0xff] %vm681_vm4, %v957_v55  ;;  %v1301_v17 = vrot.slane %v1275_v38, 4  ;;  %v1040_v39 = vsel %vm459_vm0, %v1037_v10, %v1039_v50  ;;  %v1143_v5 = vrot.slane %v2226_v52, 3 }
 0x1e4   :  { %1000 = vst.msk [vmem:[%s2388_s2 + $0x2e] sm:$0x3] %vm993_vm7, %v971_v56  ;;  %v1302_v46 = vrot.slane %v1276_v60, 4  ;;  %v1195_v58 = vrot.slane %v2226_v52, 4  ;;  %v1067_v3 = vmax.f32 %v2187_v51, %v1038_v20  ;;  %v1068_v9 = vmax.f32 %v2230_v7, %v1040_v39 }
 0x1e5   :  { %v1090_v22 = vsel %vm504_vm1, %v1087_v16, %v1089_v61  ;;  %v1193_v36 = vrot.slane %v2230_v7, 4  ;;  %v1092_v25 = vsel %vm504_vm1, %v1089_v61, %v1091_v62  ;;  %v1222_v59 = vmax.f32 %v1170_v63, %v1192_v31 }
 0x1e6   :  { %v1303_v34 = vsel %vm594_vm3, %v1301_v17, %v1302_v46  ;;  %v1305_v32 = vsel %vm594_vm3, %v1302_v46, %v1304_v15  ;;  %v961_v35 = vpop.permute.xlu1 %960  ;;  %v955_v44 = vpop.permute.xlu0 %954  ;;  %v1119_v53 = vmax.f32 %v1067_v3, %v1090_v22  ;;  %v1120_v16 = vmax.f32 %v1068_v9, %v1092_v25 }
 0x1e7   :  { %v1326_v45 = vmax.f32 %v1275_v38, %v1303_v34  ;;  %v1327_v6 = vmax.f32 %v1276_v60, %v1305_v32  ;;  %995 = vst.msk [vmem:[%s2388_s2 + $0xe] sm:$0xfc] %vm990_vm8, %v961_v35  ;;  %991 = vst.msk [vmem:[%s2388_s2 - $0x2] sm:$0xfc] %vm990_vm8, %v955_v44  ;;  %v1142_v33 = vsel %vm549_vm2, %v1139_v11, %v1141_v30 }
 0x1e8   :  { %v1144_v28 = vsel %vm549_vm2, %v1141_v30, %v1143_v5  ;;  %v1171_v8 = vmax.f32 %v1119_v53, %v1142_v33  ;;  %v2295_v29 = vmax.f32 %v1985_v41, %v2194_v2  ;;  %v2299_v11 = vmax.f32 %v1988_v42, %v2196_v0 }
 0x1e9   :  { %1334 = vst.msk [vmem:[%s2387_s3 + $0x10] sm:$0xff] %vm681_vm4, %v1326_v45  ;;  %1335 = vst.msk [vmem:[%s2387_s3 + $0x18] sm:$0xff] %vm681_vm4, %v1327_v6  ;;  %v1172_v13 = vmax.f32 %v1120_v16, %v1144_v28  ;;  %v1194_v12 = vsel %vm594_vm3, %v1191_v26, %v1193_v36  ;;  %v1196_v52 = vsel %vm594_vm3, %v1193_v36, %v1195_v58  ;;  %v1250_v42 = vrot.slane %v1222_v59, 4 }
 0x1ea   :  { %v969_v27 = vpop.permute.xlu1 %968  ;;  %v963_v7 = vpop.permute.xlu0 %962  ;;  %v1223_v47 = vmax.f32 %v1171_v8, %v1194_v12  ;;  %v1042_v40 = vrot.slane %v2295_v29, 1  ;;  %v1094_v14 = vrot.slane %v2295_v29, 2  ;;  %v2309_v41 = vmax.f32 %v2013_v21, %v2210_v18 }
 0x1eb   :  { %999 = vst.msk [vmem:[%s2388_s2 + $0x26] sm:$0xff] %vm681_vm4, %v969_v27  ;;  %996 = vst.msk [vmem:[%s2388_s2 + $0x16] sm:$0xff] %vm681_vm4, %v963_v7  ;;  %v1224_v51 = vmax.f32 %v1172_v13, %v1196_v52  ;;  %v1041_v2 = vrot.slane %v2299_v11, 1  ;;  %v1093_v0 = vrot.slane %v2299_v11, 2  ;;  %v1146_v21 = vrot.slane %v2295_v29, 3 }
 0x1ec   :  { %v1251_v26 = vrot.slane %v1223_v47, 4  ;;  %v1145_v18 = vrot.slane %v2299_v11, 3  ;;  %v457_v48 = vmax.f32 %v2016_v57, %v2212_v43  ;;  %v1198_v54 = vrot.slane %v2295_v29, 4 }
 0x1ed   :  { %v1253_v49 = vrot.slane %v1224_v51, 4  ;;  %v1043_v23 = vsel %vm459_vm0, %v1041_v2, %v1042_v40  ;;  %v1197_v24 = vrot.slane %v2299_v11, 4  ;;  %v1095_v19 = vsel %vm504_vm1, %v1093_v0, %v1094_v14 }
 0x1ee   :  { %v967_v31 = vpop.permute.xlu0 %966  ;;  %v1252_v50 = vsel %vm594_vm3, %v1250_v42, %v1251_v26  ;;  %v1069_v37 = vmax.f32 %v2299_v11, %v1043_v23  ;;  %v1046_v1 = vrot.slane %v2309_v41, 1  ;;  %v1098_v38 = vrot.slane %v2309_v41, 2 }
 0x1ef   :  { %998 = vst.msk [vmem:[%s2388_s2 + $0x1e] sm:$0xfc] %vm990_vm8, %v967_v31  ;;  %v1254_v57 = vsel %vm594_vm3, %v1251_v26, %v1253_v49  ;;  %v1278_v43 = vmax.f32 %v1222_v59, %v1252_v50  ;;  %v1280_v4 = vmax.f32 %v1224_v51, %v1253_v49  ;;  %v1147_v61 = vsel %vm549_vm2, %v1145_v18, %v1146_v21 }
 0x1f0   :  { %v1279_v60 = vmax.f32 %v1223_v47, %v1254_v57  ;;  %v1121_v10 = vmax.f32 %v1069_v37, %v1095_v19  ;;  %v1044_v55 = vrot.slane %v457_v48, 1  ;;  %v1150_v63 = vrot.slane %v2309_v41, 3 }
 0x1f1   :  { %v1306_v56 = vrot.slane %v1278_v43, 4  ;;  %v1309_v15 = vrot.slane %v1280_v4, 4  ;;  %v1096_v62 = vrot.slane %v457_v48, 2  ;;  %v1148_v20 = vrot.slane %v457_v48, 3 }
 0x1f2   :  { %v1307_v30 = vrot.slane %v1279_v60, 4  ;;  %v1045_v17 = vsel %vm459_vm0, %v1042_v40, %v1044_v55  ;;  %v1047_v46 = vsel %vm459_vm0, %v1044_v55, %v1046_v1  ;;  %v973_v39 = vpop.permute.xlu1 %972  ;;  %v1173_v5 = vmax.f32 %v1121_v10, %v1147_v61 }
 0x1f3   :  { %v1202_v58 = vrot.slane %v2309_v41, 4  ;;  %v1070_v3 = vmax.f32 %v2295_v29, %v1045_v17  ;;  %v1071_v9 = vmax.f32 %v457_v48, %v1047_v46  ;;  %1001 = vst.msk [vmem:[%s2388_s2 + $0x2e] sm:$0xfc] %vm990_vm8, %v973_v39  ;;  %v1097_v22 = vsel %vm504_vm1, %v1094_v14, %v1096_v62 }
 0x1f4   :  { %v1308_v34 = vsel %vm594_vm3, %v1306_v56, %v1307_v30  ;;  %v1310_v32 = vsel %vm594_vm3, %v1307_v30, %v1309_v15  ;;  %v1099_v36 = vsel %vm504_vm1, %v1096_v62, %v1098_v38  ;;  %v1199_v53 = vsel %vm594_vm3, %v1197_v24, %v1198_v54 }
 0x1f5   :  { %v975_v35 = vpop.permute.xlu0 %974  ;;  %v1328_v44 = vmax.f32 %v1278_v43, %v1308_v34  ;;  %v1329_v45 = vmax.f32 %v1279_v60, %v1310_v32  ;;  %v1122_v6 = vmax.f32 %v1070_v3, %v1097_v22  ;;  %v1123_v25 = vmax.f32 %v1071_v9, %v1099_v36 }
 0x1f6   :  { %1002 = vst.msk [vmem:[%s2388_s2 + $0x36] sm:$0xff] %vm681_vm4, %v975_v35  ;;  %v1149_v59 = vsel %vm549_vm2, %v1146_v21, %v1148_v20  ;;  %v1151_v16 = vsel %vm549_vm2, %v1148_v20, %v1150_v63  ;;  %v1200_v33 = vrot.slane %v457_v48, 4  ;;  %v977_v28 = vpop.permute.xlu1 %976  ;;  %v1225_v8 = vmax.f32 %v1173_v5, %v1199_v53 }
 0x1f7   :  { %1336 = vst.msk [vmem:[%s2387_s3 + $0x20] sm:$0xff] %vm681_vm4, %v1328_v44  ;;  %1337 = vst.msk [vmem:[%s2387_s3 + $0x28] sm:$0xff] %vm681_vm4, %v1329_v45  ;;  %v1174_v29 = vmax.f32 %v1122_v6, %v1149_v59  ;;  %v1175_v11 = vmax.f32 %v1123_v25, %v1151_v16 }
 0x1f8   :  { %1003 = vst.msk [vmem:[%s2388_s2 + $0x3e] sm:$0x3] %vm993_vm7, %v977_v28  ;;  %v1201_v13 = vsel %vm594_vm3, %v1198_v54, %v1200_v33  ;;  %v1203_v12 = vsel %vm594_vm3, %v1200_v33, %v1202_v58  ;;  %v1255_v7 = vrot.slane %v1225_v8, 4 }
 0x1f9   :  { %v1226_v52 = vmax.f32 %v1174_v29, %v1201_v13  ;;  %v1227_v27 = vmax.f32 %v1175_v11, %v1203_v12 }
 0x1fb   :  { %v1256_v47 = vrot.slane %v1226_v52, 4  ;;  %v1258_v40 = vrot.slane %v1227_v27, 4 }
 0x1fd   :  { %v1257_v14 = vsel %vm594_vm3, %v1255_v7, %v1256_v47  ;;  %v1259_v41 = vsel %vm594_vm3, %v1256_v47, %v1258_v40  ;;  %v1283_v42 = vmax.f32 %v1227_v27, %v1258_v40 }
 0x1fe   :  { %v1281_v51 = vmax.f32 %v1225_v8, %v1257_v14  ;;  %v1282_v2 = vmax.f32 %v1226_v52, %v1259_v41 }
 0x1ff   :  { %v1314_v0 = vrot.slane %v1283_v42, 4 }
 0x200   :  { %v1311_v26 = vrot.slane %v1281_v51, 4  ;;  %v1312_v21 = vrot.slane %v1282_v2, 4 }
 0x202   :  { %v1313_v18 = vsel %vm594_vm3, %v1311_v26, %v1312_v21  ;;  %v1315_v48 = vsel %vm594_vm3, %v1312_v21, %v1314_v0 }
 0x203   :  { %v1330_v49 = vmax.f32 %v1281_v51, %v1313_v18  ;;  %v1331_v54 = vmax.f32 %v1282_v2, %v1315_v48 }
 0x205   :  { %1338 = vst.msk [vmem:[%s2387_s3 + $0x30] sm:$0xff] %vm681_vm4, %v1330_v49  ;;  %1339 = vst.msk [vmem:[%s2387_s3 + $0x38] sm:$0xff] %vm681_vm4, %v1331_v54 }

</bundles_post_ra>
